<compile_context>
chip_gen: v5e
topology: v5e:2x2
jax: 0.10.0
libtpu: 0.0.40
codegen_flags: <defaults>
</compile_context>

<pallas_src>
import functools

import numpy as np
import jax
import jax.numpy as jnp
from jax.experimental import pallas as pl
from jax.experimental.pallas import tpu as pltpu


# ----------------------------------------------------------------------------
# Anchor utilities (pure numpy glue, identical semantics to the reference).
# ----------------------------------------------------------------------------
def generate_anchor_template(base_size=16, ratios=(0.5, 1.0, 2.0),
                             scales=(8, 16, 32)):
    py = base_size / 2.0
    px = base_size / 2.0
    anchor_base = np.zeros((len(ratios) * len(scales), 4), dtype=np.float32)
    for i, r in enumerate(ratios):
        for j, s in enumerate(scales):
            h = base_size * s * np.sqrt(r)
            w = base_size * s * np.sqrt(1.0 / r)
            idx = i * len(scales) + j
            anchor_base[idx, 0] = py - h / 2.0
            anchor_base[idx, 1] = px - w / 2.0
            anchor_base[idx, 2] = py + h / 2.0
            anchor_base[idx, 3] = px + w / 2.0
    return anchor_base


def _enumerate_shifted_anchor(anchor_base, feat_stride, height, width):
    shift_y = np.arange(0, height * feat_stride, feat_stride)
    shift_x = np.arange(0, width * feat_stride, feat_stride)
    shift_x, shift_y = np.meshgrid(shift_x, shift_y)
    shift = np.stack((shift_y.ravel(), shift_x.ravel(),
                      shift_y.ravel(), shift_x.ravel()), axis=1)
    A = anchor_base.shape[0]
    K = shift.shape[0]
    anchor = anchor_base.reshape((1, A, 4)) + \
        shift.reshape((1, K, 4)).transpose((1, 0, 2))
    anchor = anchor.reshape((K * A, 4)).astype(np.float32)
    return anchor


# ----------------------------------------------------------------------------
# Pallas kernel: fused conv1(3x3, pad=1) + ReLU + fused score/loc 1x1 heads.
# ----------------------------------------------------------------------------
def _rpn_kernel(xp_ref, w1_ref, b1_ref, wh_ref, bh_ref, out_ref, acc_ref,
                *, TH, W, C_mid):
    """One (image, row-tile) grid step.

    xp_ref : (1, 1, (TH+2)*(W+2), C_in)  bf16  flattened padded tile (1-row halo)
    w1_ref : (3, 3, C_in, C_mid)         bf16  3x3 conv weight (HWIO)
    b1_ref : (1, C_mid)                  f32   conv bias
    wh_ref : (C_mid, n_pad)              bf16  fused [score | loc | zero-pad]
    bh_ref : (1, n_pad)                  f32   fused bias
    out_ref: (1, TH*(W+2), n_pad)        f32   lane-dense fused head output
    acc_ref: (3, TH*(W+2)+8, C_mid)      f32   per-dx-column accumulators
    """
    Wp = W + 2
    P = TH * Wp

    # Scratch persists across grid steps: re-zero the per-dx accumulators
    # (also keeps the 8 tail rows used by the shifted reads below at zero).
    acc_ref[...] = jnp.zeros_like(acc_ref)

    # 3x3 / pad=1 / stride=1 conv as 9 bf16 MXU matmuls over *contiguous*
    # padded-width row slabs -- no strided per-tap patch materialization.
    # Column (dx) alignment is deferred to three post-matmul slice-adds.
    for dy in range(3):
        rows = xp_ref[0, 0, dy * Wp:dy * Wp + P, :]          # (P, C_in) bf16
        for dx in range(3):
            acc_ref[dx, 0:P, :] += jnp.dot(
                rows, w1_ref[dy, dx], preferred_element_type=jnp.float32)

    # Combine the three column taps: conv[p] = a0[p] + a1[p+1] + a2[p+2].
    # The +1/+2 reads stay in bounds thanks to the zero tail rows; any garbage
    # lands only in the two padded columns, which the wrapper strips.
    conv = (acc_ref[0, 0:P, :]
            + acc_ref[1, 1:P + 1, :]
            + acc_ref[2, 2:P + 2, :])                        # (P, C_mid) f32

    # Bias + ReLU (bias broadcast hoisted out of the tap loops), bf16 for MXU.
    h = jnp.maximum(conv + b1_ref[...], 0.0).astype(jnp.bfloat16)

    # Fused score+loc 1x1 heads: a single lane-dense (128-wide) matmul so the
    # output store is an unmasked full-lane store.
    head = jnp.dot(h, wh_ref[...], preferred_element_type=jnp.float32)
    out_ref[0] = (head + bh_ref[...]).astype(out_ref.dtype)


def _vmem_bytes_estimate(TH, W, C_in, C_mid, n_pad):
    """Rough per-grid-step VMEM footprint (double-buffered I/O + scratch)."""
    Wp = W + 2
    P = TH * Wp
    inp = 2 * (TH + 2) * Wp * C_in * 2                    # bf16 input tile x2
    wts = 2 * (9 * C_in * C_mid + C_mid * n_pad) * 2      # bf16 weights x2
    wts += 2 * (C_mid + n_pad) * 4 * 2                    # f32 biases x2
    acc = 3 * (P + 8) * C_mid * 4                         # f32 dx accumulators
    act = 2 * P * C_mid * 4                               # conv / h intermediates
    out = 2 * P * n_pad * 4                               # f32 output tile x2
    return inp + wts + acc + act + out


def _pick_tile_h(H, W, C_in, C_mid, n_pad, budget=8 * 1024 * 1024):
    """Largest row-tile TH dividing H that keeps the kernel blocks sublane
    aligned and fits a conservative VMEM budget (re-derived per shape)."""
    for th in range(H, 0, -1):
        if H % th:
            continue
        if th != H and (th * (W + 2)) % 8:
            continue
        if _vmem_bytes_estimate(th, W, C_in, C_mid, n_pad) <= budget:
            return th
    return H  # fall back to a whole-image block


def rpn_heads_pallas(x_nchw, params, *, tile_h=None):
    """Runs the RPN conv heads on TPU. Returns (score, loc) in NHWC-flattened
    form: score (N, H*W, 2*A) f32, loc (N, H*W, 4*A) f32."""
    N, C_in, H, W = x_nchw.shape
    w1, b1 = params["w1"], params["b1"]          # (3,3,Cin,Cmid), (1,Cmid)
    ws, bs = params["ws"], params["bs"]          # (Cmid, 2A), (1, 2A)
    wl, bl = params["wl"], params["bl"]          # (Cmid, 4A), (1, 4A)
    C_mid = w1.shape[-1]
    n_score, n_loc = ws.shape[-1], wl.shape[-1]
    n_head = n_score + n_loc
    n_pad = max(128, ((n_head + 127) // 128) * 128)   # lane-dense output width
    Wp = W + 2

    if tile_h is None:
        tile_h = _pick_tile_h(H, W, C_in, C_mid, n_pad)
    TH = int(tile_h)
    if H % TH != 0:
        raise ValueError(f"tile_h={TH} must divide H={H}")
    if TH != H and (TH * Wp) % 8 != 0:
        raise ValueError("tile_h*(W+2) must be a multiple of 8 unless tile_h==H")
    nTH = H // TH
    P = TH * Wp

    # --- glue: NCHW -> NHWC, pad by 1, bf16, halo-expanded row tiles ---------
    x_nhwc = jnp.transpose(x_nchw, (0, 2, 3, 1)).astype(jnp.float32)
    x_pad = jnp.pad(x_nhwc, ((0, 0), (1, 1), (1, 1), (0, 0))).astype(jnp.bfloat16)
    x_tiles = jnp.stack(
        [x_pad[:, t * TH:t * TH + TH + 2] for t in range(nTH)], axis=1)
    x_tiles = x_tiles.reshape(N, nTH, (TH + 2) * Wp, C_in)

    # --- fused, lane-padded score+loc head weights (bf16) / bias (f32) -------
    w_head = jnp.pad(jnp.concatenate([ws, wl], axis=1).astype(jnp.float32),
                     ((0, 0), (0, n_pad - n_head))).astype(jnp.bfloat16)
    b_head = jnp.pad(jnp.concatenate([bs, bl], axis=1).astype(jnp.float32),
                     ((0, 0), (0, n_pad - n_head)))

    kernel = functools.partial(_rpn_kernel, TH=TH, W=W, C_mid=C_mid)
    vmem_limit = int(min(64 * 1024 * 1024,
                         max(32 * 1024 * 1024,
                             2 * _vmem_bytes_estimate(TH, W, C_in, C_mid,
                                                      n_pad))))

    out = pl.pallas_call(
        kernel,
        out_shape=jax.ShapeDtypeStruct((N, H * Wp, n_pad), jnp.float32),
        grid_spec=pltpu.PrefetchScalarGridSpec(
            num_scalar_prefetch=0,
            grid=(N, nTH),
            in_specs=[
                pl.BlockSpec((1, 1, (TH + 2) * Wp, C_in),
                             lambda n, t: (n, t, 0, 0)),
                # Constant index_map: DMA'd once; kept double-buffered (small).
                pl.BlockSpec((3, 3, C_in, C_mid), lambda n, t: (0, 0, 0, 0)),
                pl.BlockSpec((1, C_mid), lambda n, t: (0, 0)),
                pl.BlockSpec((C_mid, n_pad), lambda n, t: (0, 0)),
                pl.BlockSpec((1, n_pad), lambda n, t: (0, 0)),
            ],
            out_specs=pl.BlockSpec((1, P, n_pad), lambda n, t: (n, t, 0)),
            scratch_shapes=[pltpu.VMEM((3, P + 8, C_mid), jnp.float32)],
        ),
        compiler_params=pltpu.CompilerParams(
            dimension_semantics=("parallel", "parallel"),
            vmem_limit_bytes=vmem_limit),
    )(x_tiles, w1.astype(jnp.bfloat16), b1.astype(jnp.float32), w_head, b_head)

    # Strip the 2 padded columns and the lane padding (cheap XLA slices).
    out = out.reshape(N, H, Wp, n_pad)[:, :, :W, :].reshape(N, H * W, n_pad)
    score = out[:, :, :n_score]
    loc = out[:, :, n_score:n_head]
    return score, loc


# ----------------------------------------------------------------------------
# Full RPN forward (mirrors RegionProposalNetwork.forward)
# ----------------------------------------------------------------------------
def rpn_forward(x_nchw, params, anchor_base, feat_stride=16,
                img_size=None, scale=1.0, tile_h=None):
    n, _, hh, ww = x_nchw.shape
    anchor = _enumerate_shifted_anchor(np.array(anchor_base), feat_stride,
                                       hh, ww)
    n_anchor = anchor.shape[0] // (hh * ww)

    score, loc = rpn_heads_pallas(x_nchw, params, tile_h=tile_h)

    rpn_locs = loc.reshape(n, -1, 4)                # (n, hh*ww*A, 4)
    rpn_scores = score.reshape(n, -1, 2)            # (n, hh*ww*A, 2)
    tmp = score.reshape(n, hh, ww, n_anchor, 2)
    rpn_softmax_scores = jax.nn.softmax(tmp, axis=4)
    rpn_fg_scores = rpn_softmax_scores[..., 1].reshape(n, -1)

    # TODO(synk): self.proposal_layer (NMS-based ROI selection) is undefined in
    # the reference module and is host-side numpy; rois/roi_indices omitted.
    rois = None
    roi_indices = None
    return rpn_locs, rpn_scores, rpn_fg_scores, rois, roi_indices, anchor


# ----------------------------------------------------------------------------
# Pure-JAX reference (same bf16 rounding of inputs/weights, f32 accumulation).
# ----------------------------------------------------------------------------
def rpn_heads_reference(x_nchw, params):
    rnd = lambda a: a.astype(jnp.bfloat16).astype(jnp.float32)
    hi = jax.lax.Precision.HIGHEST
    x = rnd(jnp.transpose(x_nchw, (0, 2, 3, 1)))
    h = jax.lax.conv_general_dilated(
        x, rnd(params["w1"]), window_strides=(1, 1), padding="SAME",
        dimension_numbers=("NHWC", "HWIO", "NHWC"), precision=hi)
    h = rnd(jnp.maximum(h + params["b1"][0], 0.0))
    score = jnp.einsum("nhwc,co->nhwo", h, rnd(params["ws"]),
                       precision=hi) + params["bs"][0]
    loc = jnp.einsum("nhwc,co->nhwo", h, rnd(params["wl"]),
                     precision=hi) + params["bl"][0]
    n, H, W, _ = score.shape
    return score.reshape(n, H * W, -1), loc.reshape(n, H * W, -1)


if __name__ == "__main__":
    # Scaled-down RPN: 64 channels, 8x14 feature map (W+2 = 16 keeps the
    # padded-width rows tile aligned; TH*(W+2) stays a multiple of 8).
    N, C_in, C_mid, H, W = 2, 64, 64, 8, 14
    feat_stride = 16
    anchor_base = generate_anchor_template()
    n_anchor = anchor_base.shape[0]                 # 9

    key = jax.random.PRNGKey(0)
    ks = jax.random.split(key, 7)
    params = {
        "w1": jax.random.normal(ks[0], (3, 3, C_in, C_mid), jnp.float32) * 0.05,
        "b1": jax.random.normal(ks[1], (1, C_mid), jnp.float32) * 0.05,
        "ws": jax.random.normal(ks[2], (C_mid, n_anchor * 2), jnp.float32) * 0.05,
        "bs": jax.random.normal(ks[3], (1, n_anchor * 2), jnp.float32) * 0.05,
        "wl": jax.random.normal(ks[4], (C_mid, n_anchor * 4), jnp.float32) * 0.05,
        "bl": jax.random.normal(ks[5], (1, n_anchor * 4), jnp.float32) * 0.05,
    }
    x = jax.random.normal(ks[6], (N, C_in, H, W), jnp.float32)

    # Tiled path: grid = (N, H/TH) = (2, 2), exercises the spatial grid axis.
    outs = rpn_forward(x, params, anchor_base, feat_stride=feat_stride,
                       tile_h=4)
    rpn_locs, rpn_scores, rpn_fg_scores, rois, roi_indices, anchor = outs
    jax.block_until_ready((rpn_locs, rpn_scores, rpn_fg_scores))

    # Shape checks (mirror the PyTorch module's output shapes).
    assert rpn_locs.shape == (N, H * W * n_anchor, 4)
    assert rpn_scores.shape == (N, H * W * n_anchor, 2)
    assert rpn_fg_scores.shape == (N, H * W * n_anchor)
    assert anchor.shape == (H * W * n_anchor, 4)

    # Numerical check against a pure-JAX reference.
    score_ref, loc_ref = rpn_heads_reference(x, params)
    np.testing.assert_allclose(np.asarray(rpn_scores),
                               np.asarray(score_ref.reshape(N, -1, 2)),
                               rtol=2e-3, atol=2e-3)
    np.testing.assert_allclose(np.asarray(rpn_locs),
                               np.asarray(loc_ref.reshape(N, -1, 4)),
                               rtol=2e-3, atol=2e-3)

    # Auto-tiled / whole-image path (heuristic picks TH = H here).
    score2, loc2 = rpn_heads_pallas(x, params)
    jax.block_until_ready((score2, loc2))
    np.testing.assert_allclose(np.asarray(score2), np.asarray(score_ref),
                               rtol=2e-3, atol=2e-3)
    np.testing.assert_allclose(np.asarray(loc2), np.asarray(loc_ref),
                               rtol=2e-3, atol=2e-3)

    print("KERNEL_OK")
</pallas_src>

<mosaic_0001>
module attributes {stable_mosaic.version = 11 : i64} {
  func.func @_rpn_kernel(%arg0: i32, %arg1: i32, %arg2: memref<1x1x96x64xbf16, #tpu.memory_space<vmem>>, %arg3: memref<3x3x64x64xbf16, #tpu.memory_space<vmem>>, %arg4: memref<1x64xf32, #tpu.memory_space<vmem>>, %arg5: memref<64x128xbf16, #tpu.memory_space<vmem>>, %arg6: memref<1x128xf32, #tpu.memory_space<vmem>>, %arg7: memref<1x64x128xf32, #tpu.memory_space<vmem>>, %arg8: memref<3x72x64xf32, #tpu.memory_space<vmem>>) attributes {dimension_semantics = [#tpu.dimension_semantics<parallel>, #tpu.dimension_semantics<parallel>], iteration_bounds = array<i64: 2, 2>, scalar_prefetch = 0 : i64, scratch_operands = 1 : i64, tpu.core_type = #tpu.core_type<tc>, window_params = [{transform_indices = @transform_0, window_bounds = array<i64: 1, 1, 96, 64>}, {pipeline_mode = #tpu.pipeline_mode<synchronous>, transform_indices = @transform_1, window_bounds = array<i64: 3, 3, 64, 64>}, {pipeline_mode = #tpu.pipeline_mode<synchronous>, transform_indices = @transform_2, window_bounds = array<i64: 1, 64>}, {pipeline_mode = #tpu.pipeline_mode<synchronous>, transform_indices = @transform_3, window_bounds = array<i64: 64, 128>}, {pipeline_mode = #tpu.pipeline_mode<synchronous>, transform_indices = @transform_4, window_bounds = array<i64: 1, 128>}, {transform_indices = @transform_5, window_bounds = array<i64: 1, 64, 128>}]} {
    %cst = arith.constant 0.000000e+00 : f32
    %0 = vector.broadcast %cst : f32 to vector<3x72x64xf32>
    %c0 = arith.constant 0 : index
    %c0_0 = arith.constant 0 : index
    %c0_1 = arith.constant 0 : index
    %1 = vector.load %arg8[%c0, %c0_0, %c0_1] : memref<3x72x64xf32, #tpu.memory_space<vmem>>, vector<3x72x64xf32>
    tpu.vector_store %arg8[%c0, %c0_0, %c0_1], %0 {strides = array<i32>} : memref<3x72x64xf32, #tpu.memory_space<vmem>>, vector<3x72x64xf32>,
    %c0_2 = arith.constant 0 : index
    %c0_3 = arith.constant 0 : index
    %c0_4 = arith.constant 0 : index
    %c0_5 = arith.constant 0 : index
    %2 = vector.load %arg2[%c0_2, %c0_3, %c0_4, %c0_5] : memref<1x1x96x64xbf16, #tpu.memory_space<vmem>>, vector<1x1x64x64xbf16>
    %3 = vector.shape_cast %2 : vector<1x1x64x64xbf16> to vector<64x64xbf16>
    %c0_6 = arith.constant 0 : index
    %c0_7 = arith.constant 0 : index
    %c0_8 = arith.constant 0 : index
    %4 = vector.load %arg8[%c0_6, %c0_7, %c0_8] : memref<3x72x64xf32, #tpu.memory_space<vmem>>, vector<1x64x64xf32>
    %5 = vector.shape_cast %4 : vector<1x64x64xf32> to vector<64x64xf32>
    %c0_9 = arith.constant 0 : index
    %c0_10 = arith.constant 0 : index
    %c0_11 = arith.constant 0 : index
    %c0_12 = arith.constant 0 : index
    %6 = vector.load %arg3[%c0_9, %c0_10, %c0_11, %c0_12] : memref<3x3x64x64xbf16, #tpu.memory_space<vmem>>, vector<1x1x64x64xbf16>
    %7 = vector.shape_cast %6 : vector<1x1x64x64xbf16> to vector<64x64xbf16>
    %cst_13 = arith.constant dense<0.000000e+00> : vector<64x64xf32>
    %8 = tpu.matmul %3, %7, %cst_13 {dimension_numbers = #tpu.dot_dimension_numbers<[1], [0], [0], [1], [0, 0, 1, 1], [], []>} : vector<64x64xbf16>, vector<64x64xbf16>, vector<64x64xf32> -> vector<64x64xf32>
    %9 = arith.addf %5, %8 : vector<64x64xf32>
    %c0_14 = arith.constant 0 : index
    %c0_15 = arith.constant 0 : index
    %c0_16 = arith.constant 0 : index
    %10 = vector.load %arg8[%c0_14, %c0_15, %c0_16] : memref<3x72x64xf32, #tpu.memory_space<vmem>>, vector<1x64x64xf32>
    %11 = vector.shape_cast %10 : vector<1x64x64xf32> to vector<64x64xf32>
    %12 = vector.shape_cast %9 : vector<64x64xf32> to vector<1x64x64xf32>
    tpu.vector_store %arg8[%c0_14, %c0_15, %c0_16], %12 {strides = array<i32>} : memref<3x72x64xf32, #tpu.memory_space<vmem>>, vector<1x64x64xf32>,
    %c1 = arith.constant 1 : index
    %c0_17 = arith.constant 0 : index
    %c0_18 = arith.constant 0 : index
    %13 = vector.load %arg8[%c1, %c0_17, %c0_18] : memref<3x72x64xf32, #tpu.memory_space<vmem>>, vector<1x64x64xf32>
    %14 = vector.shape_cast %13 : vector<1x64x64xf32> to vector<64x64xf32>
    %c0_19 = arith.constant 0 : index
    %c1_20 = arith.constant 1 : index
    %c0_21 = arith.constant 0 : index
    %c0_22 = arith.constant 0 : index
    %15 = vector.load %arg3[%c0_19, %c1_20, %c0_21, %c0_22] : memref<3x3x64x64xbf16, #tpu.memory_space<vmem>>, vector<1x1x64x64xbf16>
    %16 = vector.shape_cast %15 : vector<1x1x64x64xbf16> to vector<64x64xbf16>
    %cst_23 = arith.constant dense<0.000000e+00> : vector<64x64xf32>
    %17 = tpu.matmul %3, %16, %cst_23 {dimension_numbers = #tpu.dot_dimension_numbers<[1], [0], [0], [1], [0, 0, 1, 1], [], []>} : vector<64x64xbf16>, vector<64x64xbf16>, vector<64x64xf32> -> vector<64x64xf32>
    %18 = arith.addf %14, %17 : vector<64x64xf32>
    %c1_24 = arith.constant 1 : index
    %c0_25 = arith.constant 0 : index
    %c0_26 = arith.constant 0 : index
    %19 = vector.load %arg8[%c1_24, %c0_25, %c0_26] : memref<3x72x64xf32, #tpu.memory_space<vmem>>, vector<1x64x64xf32>
    %20 = vector.shape_cast %19 : vector<1x64x64xf32> to vector<64x64xf32>
    %21 = vector.shape_cast %18 : vector<64x64xf32> to vector<1x64x64xf32>
    tpu.vector_store %arg8[%c1_24, %c0_25, %c0_26], %21 {strides = array<i32>} : memref<3x72x64xf32, #tpu.memory_space<vmem>>, vector<1x64x64xf32>,
    %c2 = arith.constant 2 : index
    %c0_27 = arith.constant 0 : index
    %c0_28 = arith.constant 0 : index
    %22 = vector.load %arg8[%c2, %c0_27, %c0_28] : memref<3x72x64xf32, #tpu.memory_space<vmem>>, vector<1x64x64xf32>
    %23 = vector.shape_cast %22 : vector<1x64x64xf32> to vector<64x64xf32>
    %c0_29 = arith.constant 0 : index
    %c2_30 = arith.constant 2 : index
    %c0_31 = arith.constant 0 : index
    %c0_32 = arith.constant 0 : index
    %24 = vector.load %arg3[%c0_29, %c2_30, %c0_31, %c0_32] : memref<3x3x64x64xbf16, #tpu.memory_space<vmem>>, vector<1x1x64x64xbf16>
    %25 = vector.shape_cast %24 : vector<1x1x64x64xbf16> to vector<64x64xbf16>
    %cst_33 = arith.constant dense<0.000000e+00> : vector<64x64xf32>
    %26 = tpu.matmul %3, %25, %cst_33 {dimension_numbers = #tpu.dot_dimension_numbers<[1], [0], [0], [1], [0, 0, 1, 1], [], []>} : vector<64x64xbf16>, vector<64x64xbf16>, vector<64x64xf32> -> vector<64x64xf32>
    %27 = arith.addf %23, %26 : vector<64x64xf32>
    %c2_34 = arith.constant 2 : index
    %c0_35 = arith.constant 0 : index
    %c0_36 = arith.constant 0 : index
    %28 = vector.load %arg8[%c2_34, %c0_35, %c0_36] : memref<3x72x64xf32, #tpu.memory_space<vmem>>, vector<1x64x64xf32>
    %29 = vector.shape_cast %28 : vector<1x64x64xf32> to vector<64x64xf32>
    %30 = vector.shape_cast %27 : vector<64x64xf32> to vector<1x64x64xf32>
    tpu.vector_store %arg8[%c2_34, %c0_35, %c0_36], %30 {strides = array<i32>} : memref<3x72x64xf32, #tpu.memory_space<vmem>>, vector<1x64x64xf32>,
    %c0_37 = arith.constant 0 : index
    %c0_38 = arith.constant 0 : index
    %c16 = arith.constant 16 : index
    %c0_39 = arith.constant 0 : index
    %31 = vector.load %arg2[%c0_37, %c0_38, %c16, %c0_39] : memref<1x1x96x64xbf16, #tpu.memory_space<vmem>>, vector<1x1x64x64xbf16>
    %32 = vector.shape_cast %31 : vector<1x1x64x64xbf16> to vector<64x64xbf16>
    %c0_40 = arith.constant 0 : index
    %c0_41 = arith.constant 0 : index
    %c0_42 = arith.constant 0 : index
    %33 = vector.load %arg8[%c0_40, %c0_41, %c0_42] : memref<3x72x64xf32, #tpu.memory_space<vmem>>, vector<1x64x64xf32>
    %34 = vector.shape_cast %33 : vector<1x64x64xf32> to vector<64x64xf32>
    %c1_43 = arith.constant 1 : index
    %c0_44 = arith.constant 0 : index
    %c0_45 = arith.constant 0 : index
    %c0_46 = arith.constant 0 : index
    %35 = vector.load %arg3[%c1_43, %c0_44, %c0_45, %c0_46] : memref<3x3x64x64xbf16, #tpu.memory_space<vmem>>, vector<1x1x64x64xbf16>
    %36 = vector.shape_cast %35 : vector<1x1x64x64xbf16> to vector<64x64xbf16>
    %cst_47 = arith.constant dense<0.000000e+00> : vector<64x64xf32>
    %37 = tpu.matmul %32, %36, %cst_47 {dimension_numbers = #tpu.dot_dimension_numbers<[1], [0], [0], [1], [0, 0, 1, 1], [], []>} : vector<64x64xbf16>, vector<64x64xbf16>, vector<64x64xf32> -> vector<64x64xf32>
    %38 = arith.addf %34, %37 : vector<64x64xf32>
    %c0_48 = arith.constant 0 : index
    %c0_49 = arith.constant 0 : index
    %c0_50 = arith.constant 0 : index
    %39 = vector.load %arg8[%c0_48, %c0_49, %c0_50] : memref<3x72x64xf32, #tpu.memory_space<vmem>>, vector<1x64x64xf32>
    %40 = vector.shape_cast %39 : vector<1x64x64xf32> to vector<64x64xf32>
    %41 = vector.shape_cast %38 : vector<64x64xf32> to vector<1x64x64xf32>
    tpu.vector_store %arg8[%c0_48, %c0_49, %c0_50], %41 {strides = array<i32>} : memref<3x72x64xf32, #tpu.memory_space<vmem>>, vector<1x64x64xf32>,
    %c1_51 = arith.constant 1 : index
    %c0_52 = arith.constant 0 : index
    %c0_53 = arith.constant 0 : index
    %42 = vector.load %arg8[%c1_51, %c0_52, %c0_53] : memref<3x72x64xf32, #tpu.memory_space<vmem>>, vector<1x64x64xf32>
    %43 = vector.shape_cast %42 : vector<1x64x64xf32> to vector<64x64xf32>
    %c1_54 = arith.constant 1 : index
    %c1_55 = arith.constant 1 : index
    %c0_56 = arith.constant 0 : index
    %c0_57 = arith.constant 0 : index
    %44 = vector.load %arg3[%c1_54, %c1_55, %c0_56, %c0_57] : memref<3x3x64x64xbf16, #tpu.memory_space<vmem>>, vector<1x1x64x64xbf16>
    %45 = vector.shape_cast %44 : vector<1x1x64x64xbf16> to vector<64x64xbf16>
    %cst_58 = arith.constant dense<0.000000e+00> : vector<64x64xf32>
    %46 = tpu.matmul %32, %45, %cst_58 {dimension_numbers = #tpu.dot_dimension_numbers<[1], [0], [0], [1], [0, 0, 1, 1], [], []>} : vector<64x64xbf16>, vector<64x64xbf16>, vector<64x64xf32> -> vector<64x64xf32>
    %47 = arith.addf %43, %46 : vector<64x64xf32>
    %c1_59 = arith.constant 1 : index
    %c0_60 = arith.constant 0 : index
    %c0_61 = arith.constant 0 : index
    %48 = vector.load %arg8[%c1_59, %c0_60, %c0_61] : memref<3x72x64xf32, #tpu.memory_space<vmem>>, vector<1x64x64xf32>
    %49 = vector.shape_cast %48 : vector<1x64x64xf32> to vector<64x64xf32>
    %50 = vector.shape_cast %47 : vector<64x64xf32> to vector<1x64x64xf32>
    tpu.vector_store %arg8[%c1_59, %c0_60, %c0_61], %50 {strides = array<i32>} : memref<3x72x64xf32, #tpu.memory_space<vmem>>, vector<1x64x64xf32>,
    %c2_62 = arith.constant 2 : index
    %c0_63 = arith.constant 0 : index
    %c0_64 = arith.constant 0 : index
    %51 = vector.load %arg8[%c2_62, %c0_63, %c0_64] : memref<3x72x64xf32, #tpu.memory_space<vmem>>, vector<1x64x64xf32>
    %52 = vector.shape_cast %51 : vector<1x64x64xf32> to vector<64x64xf32>
    %c1_65 = arith.constant 1 : index
    %c2_66 = arith.constant 2 : index
    %c0_67 = arith.constant 0 : index
    %c0_68 = arith.constant 0 : index
    %53 = vector.load %arg3[%c1_65, %c2_66, %c0_67, %c0_68] : memref<3x3x64x64xbf16, #tpu.memory_space<vmem>>, vector<1x1x64x64xbf16>
    %54 = vector.shape_cast %53 : vector<1x1x64x64xbf16> to vector<64x64xbf16>
    %cst_69 = arith.constant dense<0.000000e+00> : vector<64x64xf32>
    %55 = tpu.matmul %32, %54, %cst_69 {dimension_numbers = #tpu.dot_dimension_numbers<[1], [0], [0], [1], [0, 0, 1, 1], [], []>} : vector<64x64xbf16>, vector<64x64xbf16>, vector<64x64xf32> -> vector<64x64xf32>
    %56 = arith.addf %52, %55 : vector<64x64xf32>
    %c2_70 = arith.constant 2 : index
    %c0_71 = arith.constant 0 : index
    %c0_72 = arith.constant 0 : index
    %57 = vector.load %arg8[%c2_70, %c0_71, %c0_72] : memref<3x72x64xf32, #tpu.memory_space<vmem>>, vector<1x64x64xf32>
    %58 = vector.shape_cast %57 : vector<1x64x64xf32> to vector<64x64xf32>
    %59 = vector.shape_cast %56 : vector<64x64xf32> to vector<1x64x64xf32>
    tpu.vector_store %arg8[%c2_70, %c0_71, %c0_72], %59 {strides = array<i32>} : memref<3x72x64xf32, #tpu.memory_space<vmem>>, vector<1x64x64xf32>,
    %c0_73 = arith.constant 0 : index
    %c0_74 = arith.constant 0 : index
    %c32 = arith.constant 32 : index
    %c0_75 = arith.constant 0 : index
    %60 = vector.load %arg2[%c0_73, %c0_74, %c32, %c0_75] : memref<1x1x96x64xbf16, #tpu.memory_space<vmem>>, vector<1x1x64x64xbf16>
    %61 = vector.shape_cast %60 : vector<1x1x64x64xbf16> to vector<64x64xbf16>
    %c0_76 = arith.constant 0 : index
    %c0_77 = arith.constant 0 : index
    %c0_78 = arith.constant 0 : index
    %62 = vector.load %arg8[%c0_76, %c0_77, %c0_78] : memref<3x72x64xf32, #tpu.memory_space<vmem>>, vector<1x64x64xf32>
    %63 = vector.shape_cast %62 : vector<1x64x64xf32> to vector<64x64xf32>
    %c2_79 = arith.constant 2 : index
    %c0_80 = arith.constant 0 : index
    %c0_81 = arith.constant 0 : index
    %c0_82 = arith.constant 0 : index
    %64 = vector.load %arg3[%c2_79, %c0_80, %c0_81, %c0_82] : memref<3x3x64x64xbf16, #tpu.memory_space<vmem>>, vector<1x1x64x64xbf16>
    %65 = vector.shape_cast %64 : vector<1x1x64x64xbf16> to vector<64x64xbf16>
    %cst_83 = arith.constant dense<0.000000e+00> : vector<64x64xf32>
    %66 = tpu.matmul %61, %65, %cst_83 {dimension_numbers = #tpu.dot_dimension_numbers<[1], [0], [0], [1], [0, 0, 1, 1], [], []>} : vector<64x64xbf16>, vector<64x64xbf16>, vector<64x64xf32> -> vector<64x64xf32>
    %67 = arith.addf %63, %66 : vector<64x64xf32>
    %c0_84 = arith.constant 0 : index
    %c0_85 = arith.constant 0 : index
    %c0_86 = arith.constant 0 : index
    %68 = vector.load %arg8[%c0_84, %c0_85, %c0_86] : memref<3x72x64xf32, #tpu.memory_space<vmem>>, vector<1x64x64xf32>
    %69 = vector.shape_cast %68 : vector<1x64x64xf32> to vector<64x64xf32>
    %70 = vector.shape_cast %67 : vector<64x64xf32> to vector<1x64x64xf32>
    tpu.vector_store %arg8[%c0_84, %c0_85, %c0_86], %70 {strides = array<i32>} : memref<3x72x64xf32, #tpu.memory_space<vmem>>, vector<1x64x64xf32>,
    %c1_87 = arith.constant 1 : index
    %c0_88 = arith.constant 0 : index
    %c0_89 = arith.constant 0 : index
    %71 = vector.load %arg8[%c1_87, %c0_88, %c0_89] : memref<3x72x64xf32, #tpu.memory_space<vmem>>, vector<1x64x64xf32>
    %72 = vector.shape_cast %71 : vector<1x64x64xf32> to vector<64x64xf32>
    %c2_90 = arith.constant 2 : index
    %c1_91 = arith.constant 1 : index
    %c0_92 = arith.constant 0 : index
    %c0_93 = arith.constant 0 : index
    %73 = vector.load %arg3[%c2_90, %c1_91, %c0_92, %c0_93] : memref<3x3x64x64xbf16, #tpu.memory_space<vmem>>, vector<1x1x64x64xbf16>
    %74 = vector.shape_cast %73 : vector<1x1x64x64xbf16> to vector<64x64xbf16>
    %cst_94 = arith.constant dense<0.000000e+00> : vector<64x64xf32>
    %75 = tpu.matmul %61, %74, %cst_94 {dimension_numbers = #tpu.dot_dimension_numbers<[1], [0], [0], [1], [0, 0, 1, 1], [], []>} : vector<64x64xbf16>, vector<64x64xbf16>, vector<64x64xf32> -> vector<64x64xf32>
    %76 = arith.addf %72, %75 : vector<64x64xf32>
    %c1_95 = arith.constant 1 : index
    %c0_96 = arith.constant 0 : index
    %c0_97 = arith.constant 0 : index
    %77 = vector.load %arg8[%c1_95, %c0_96, %c0_97] : memref<3x72x64xf32, #tpu.memory_space<vmem>>, vector<1x64x64xf32>
    %78 = vector.shape_cast %77 : vector<1x64x64xf32> to vector<64x64xf32>
    %79 = vector.shape_cast %76 : vector<64x64xf32> to vector<1x64x64xf32>
    tpu.vector_store %arg8[%c1_95, %c0_96, %c0_97], %79 {strides = array<i32>} : memref<3x72x64xf32, #tpu.memory_space<vmem>>, vector<1x64x64xf32>,
    %c2_98 = arith.constant 2 : index
    %c0_99 = arith.constant 0 : index
    %c0_100 = arith.constant 0 : index
    %80 = vector.load %arg8[%c2_98, %c0_99, %c0_100] : memref<3x72x64xf32, #tpu.memory_space<vmem>>, vector<1x64x64xf32>
    %81 = vector.shape_cast %80 : vector<1x64x64xf32> to vector<64x64xf32>
    %c2_101 = arith.constant 2 : index
    %c2_102 = arith.constant 2 : index
    %c0_103 = arith.constant 0 : index
    %c0_104 = arith.constant 0 : index
    %82 = vector.load %arg3[%c2_101, %c2_102, %c0_103, %c0_104] : memref<3x3x64x64xbf16, #tpu.memory_space<vmem>>, vector<1x1x64x64xbf16>
    %83 = vector.shape_cast %82 : vector<1x1x64x64xbf16> to vector<64x64xbf16>
    %cst_105 = arith.constant dense<0.000000e+00> : vector<64x64xf32>
    %84 = tpu.matmul %61, %83, %cst_105 {dimension_numbers = #tpu.dot_dimension_numbers<[1], [0], [0], [1], [0, 0, 1, 1], [], []>} : vector<64x64xbf16>, vector<64x64xbf16>, vector<64x64xf32> -> vector<64x64xf32>
    %85 = arith.addf %81, %84 : vector<64x64xf32>
    %c2_106 = arith.constant 2 : index
    %c0_107 = arith.constant 0 : index
    %c0_108 = arith.constant 0 : index
    %86 = vector.load %arg8[%c2_106, %c0_107, %c0_108] : memref<3x72x64xf32, #tpu.memory_space<vmem>>, vector<1x64x64xf32>
    %87 = vector.shape_cast %86 : vector<1x64x64xf32> to vector<64x64xf32>
    %88 = vector.shape_cast %85 : vector<64x64xf32> to vector<1x64x64xf32>
    tpu.vector_store %arg8[%c2_106, %c0_107, %c0_108], %88 {strides = array<i32>} : memref<3x72x64xf32, #tpu.memory_space<vmem>>, vector<1x64x64xf32>,
    %c0_109 = arith.constant 0 : index
    %c0_110 = arith.constant 0 : index
    %c0_111 = arith.constant 0 : index
    %89 = vector.load %arg8[%c0_109, %c0_110, %c0_111] : memref<3x72x64xf32, #tpu.memory_space<vmem>>, vector<1x64x64xf32>
    %90 = vector.shape_cast %89 : vector<1x64x64xf32> to vector<64x64xf32>
    %c1_112 = arith.constant 1 : index
    %c1_113 = arith.constant 1 : index
    %c0_114 = arith.constant 0 : index
    %91 = vector.load %arg8[%c1_112, %c1_113, %c0_114] : memref<3x72x64xf32, #tpu.memory_space<vmem>>, vector<1x64x64xf32>
    %92 = vector.shape_cast %91 : vector<1x64x64xf32> to vector<64x64xf32>
    %93 = arith.addf %90, %92 : vector<64x64xf32>
    %c2_115 = arith.constant 2 : index
    %c2_116 = arith.constant 2 : index
    %c0_117 = arith.constant 0 : index
    %94 = vector.load %arg8[%c2_115, %c2_116, %c0_117] : memref<3x72x64xf32, #tpu.memory_space<vmem>>, vector<1x64x64xf32>
    %95 = vector.shape_cast %94 : vector<1x64x64xf32> to vector<64x64xf32>
    %96 = arith.addf %93, %95 : vector<64x64xf32>
    %c0_118 = arith.constant 0 : index
    %c0_119 = arith.constant 0 : index
    %97 = vector.load %arg4[%c0_118, %c0_119] : memref<1x64xf32, #tpu.memory_space<vmem>>, vector<1x64xf32>
    %98 = vector.broadcast %97 : vector<1x64xf32> to vector<64x64xf32>
    %99 = arith.addf %96, %98 : vector<64x64xf32>
    %cst_120 = arith.constant 0.000000e+00 : f32
    %100 = vector.broadcast %cst_120 : f32 to vector<64x64xf32>
    %101 = arith.maximumf %99, %100 : vector<64x64xf32>
    %102 = arith.truncf %101 : vector<64x64xf32> to vector<64x64xbf16>
    %c0_121 = arith.constant 0 : index
    %c0_122 = arith.constant 0 : index
    %103 = vector.load %arg5[%c0_121, %c0_122] : memref<64x128xbf16, #tpu.memory_space<vmem>>, vector<64x128xbf16>
    %cst_123 = arith.constant dense<0.000000e+00> : vector<64x128xf32>
    %104 = tpu.matmul %102, %103, %cst_123 {dimension_numbers = #tpu.dot_dimension_numbers<[1], [0], [0], [1], [0, 0, 1, 1], [], []>} : vector<64x64xbf16>, vector<64x128xbf16>, vector<64x128xf32> -> vector<64x128xf32>
    %c0_124 = arith.constant 0 : index
    %c0_125 = arith.constant 0 : index
    %105 = vector.load %arg6[%c0_124, %c0_125] : memref<1x128xf32, #tpu.memory_space<vmem>>, vector<1x128xf32>
    %106 = vector.broadcast %105 : vector<1x128xf32> to vector<64x128xf32>
    %107 = arith.addf %104, %106 : vector<64x128xf32>
    %c0_126 = arith.constant 0 : index
    %c0_127 = arith.constant 0 : index
    %c0_128 = arith.constant 0 : index
    %108 = vector.load %arg7[%c0_126, %c0_127, %c0_128] : memref<1x64x128xf32, #tpu.memory_space<vmem>>, vector<1x64x128xf32>
    %109 = vector.shape_cast %108 : vector<1x64x128xf32> to vector<64x128xf32>
    %110 = vector.shape_cast %107 : vector<64x128xf32> to vector<1x64x128xf32>
    tpu.vector_store %arg7[%c0_126, %c0_127, %c0_128], %110 {strides = array<i32>} : memref<1x64x128xf32, #tpu.memory_space<vmem>>, vector<1x64x128xf32>,
    return
  }
  func.func @transform_0(%arg0: i32, %arg1: i32) -> (i32, i32, i32, i32) {
    %c0_i32 = arith.constant 0 : i32
    %c0_i32_0 = arith.constant 0 : i32
    %c0_i32_1 = arith.constant 0 : i32
    return %arg0, %arg1, %c0_i32, %c0_i32_0 : i32, i32, i32, i32
  }
  func.func @transform_1(%arg0: i32, %arg1: i32) -> (i32, i32, i32, i32) {
    %c0_i32 = arith.constant 0 : i32
    %c0_i32_0 = arith.constant 0 : i32
    %c0_i32_1 = arith.constant 0 : i32
    %c0_i32_2 = arith.constant 0 : i32
    %c0_i32_3 = arith.constant 0 : i32
    return %c0_i32, %c0_i32_0, %c0_i32_1, %c0_i32_2 : i32, i32, i32, i32
  }
  func.func @transform_2(%arg0: i32, %arg1: i32) -> (i32, i32) {
    %c0_i32 = arith.constant 0 : i32
    %c0_i32_0 = arith.constant 0 : i32
    %c0_i32_1 = arith.constant 0 : i32
    return %c0_i32, %c0_i32_0 : i32, i32
  }
  func.func @transform_3(%arg0: i32, %arg1: i32) -> (i32, i32) {
    %c0_i32 = arith.constant 0 : i32
    %c0_i32_0 = arith.constant 0 : i32
    %c0_i32_1 = arith.constant 0 : i32
    return %c0_i32, %c0_i32_0 : i32, i32
  }
  func.func @transform_4(%arg0: i32, %arg1: i32) -> (i32, i32) {
    %c0_i32 = arith.constant 0 : i32
    %c0_i32_0 = arith.constant 0 : i32
    %c0_i32_1 = arith.constant 0 : i32
    return %c0_i32, %c0_i32_0 : i32, i32
  }
  func.func @transform_5(%arg0: i32, %arg1: i32) -> (i32, i32, i32) {
    %c0_i32 = arith.constant 0 : i32
    %c0_i32_0 = arith.constant 0 : i32
    return %arg0, %arg1, %c0_i32 : i32, i32, i32
  }
}

</mosaic_0001>

<bundles_post_ra>
// kernel: tpu_custom_call.1
= control target key start
LH: loop header
LB: loop body
LE: loop exit
PB: predicated region body
PF: predicated region fallthrough
CT: control target
= control target key end

     0   :  { %10 = vsyncpa [#allocation4], 0  ;;  %s2556_s0 = inlined_call_operand.vmem [shape: bf16[2,2,96,64], index: 0, kind: input, shape index: {}]   ;;  %s2557_s1 = inlined_call_operand.vmem [shape: bf16[3,3,64,64], index: 1, kind: input, shape index: {}]   ;;  %s2558_s2 = inlined_call_operand.hbm [shape: f32[1,64], index: 2, kind: input, shape index: {}]   ;;  %s2559_s3 = inlined_call_operand.vmem [shape: bf16[64,128], index: 3, kind: input, shape index: {}]   ;;  %s2560_s4 = inlined_call_operand.vmem [shape: f32[1,128], index: 4, kind: input, shape index: {}]   ;;  %s2561_s5 = inlined_call_operand.hbm [shape: f32[2,128,128], index: 5, kind: output, shape index: {}]  }
   0x1   :  { %11 = vsyncpa [#allocation5], 0 }
   0x2   :  { %13 = vsyncpa [#allocation5 + $0x1], 0  ;;  %s2095_s18 = smov 0   ;;  %s2097_s19 = smov 0  }
   0x3   :  { %s2099_s20 = smov 0   ;;  %s2101_s21 = smov 0  }
   0x4   :  { %s2103_s22 = smov 0   ;;  %s2105_s23 = smov 0  }
   0x5   :  { %s2107_s24 = smov 0   ;;  %s2109_s25 = smov 0  }
   0x6 LB: > { %s1455_s26 = sadd.s32 4294967295, %s2059_s25   ;;  %s1456_s27 = sadd.s32 4294967294, %s2059_s25   ;;  %s2059_s25 = sphi %s2109_s25, %s19_s25   ;;  %s2055_s24 = sphi %s2107_s24, %s2570_s24   ;;  %s2051_s23 = sphi %s2105_s23, %s2569_s23   ;;  %s2047_s22 = sphi %s2103_s22, %s2568_s22   ;;  %s2043_s21 = sphi %s2101_s21, %s2567_s21   ;;  %s2039_s20 = sphi %s2099_s20, %s2566_s20   ;;  %s2035_s19 = sphi %s2097_s19, %s2565_s19   ;;  %s2031_s18 = sphi %s2095_s18, %s2564_s18  }
   0x7   : > { %s28_s28 = sadd.s32 1, %s2051_s23  ;;  %s31_s29 = sadd.s32 1, %s2055_s24 }
   0x8   : > { %p29_p0 = scmp.ge.s32.totalorder %s28_s28, 2  ;;  %s152_s30 = sadd.s32 1, %s2039_s20 }
   0x9   : > { %p162_p1 = scmp.ne.s32.totalorder %s2039_s20, %s2035_s19  ;;  %p163_p2 = scmp.eq.s32.totalorder %s1455_s26, 3 }
   0xa   : > { %s2572_s28 = smov (%p29_p0, %s28_s28), 0  ;;  %s2574_s29 = smov (!%p29_p0, %s31_s29), %s2055_s24 }
   0xb   : > { %s148_s6 = ssub.s32 %s2051_s23, %s2572_s28  ;;  %p2147_p3 = por %p163_p2, %p162_p1 }
   0xc   : > { %p33_p4 = scmp.ge.s32.totalorder %s2574_s29, 2  ;;  %p168_p5 = scmp.ne.s32.totalorder %s2035_s19, %s2031_s18 }
   0xd   : > { %p169_p6 = scmp.eq.s32.totalorder %s1456_s27, 3  ;;  %p1457_p7 = scmp.ge.s32.totalorder %s2059_s25, 1 }
   0xe   : > { %s2576_s29 = smov (%p33_p4, %s2574_s29), 0  ;;  %p176_p9 = scmp.lt.s32.totalorder %s2059_s25, 5 }
   0xf   : > { %p2156_p8 = por %p169_p6, %p168_p5  ;;  %s147_s9 = ssub.s32 %s2055_s24, %s2576_s29 }
  0x10   : > { %s149_s10 = sor.u32 %s148_s6, %s147_s9  ;;  %p177_p10 = pnand %p1457_p7, %p176_p9 }
  0x11   : > { %p150_p11 = scmp.eq.s32.totalorder %s149_s10, 0  ;;  %p1858_p12 = scmp.eq.s32.totalorder %s1455_s26, 0 }
  0x12   : > { %p1850_p13 = pneg %p177_p10  ;;  %s191_s13 = sshll.u32 %s2558_s2, 4  ;;  %s192_s13 = int_to_ptr.hbm [resolvable:$true] %s191_s13 }
  0x13   : > { %s2167_s14 = scalar_select %p150_p11, %s2039_s20, %s152_s30  }
  0x14   : > { %s2061_s15 = smov [#allocation3]   ;;  %p1851_p0 = pnand %p1858_p12, %p1850_p13 }
  0x15   : > { %s193_s16 = sshll.u32 %s2061_s15, 4  ;;  %224 = sbr.rel (%p177_p10) target bundleno = 499 (0x1f3), region = 40  ;;  %s194_s16 = int_to_ptr.vmem [resolvable:$true] %s193_s16 }
  0x16   : > { %1853 = dma.hbm_to_vmem [thread:$0]  (!%p1851_p0), %s192_s13, 16, %s194_s16, [#allocation4]  }
  0x1a   : > { %2022 = dma.done.wait (%p1858_p12), [#allocation4], 16  }
  0x1b   : > { %2024 = vsyncadd (%p1858_p12), [#allocation4], 4294967280  ;;  %vm268_vm0 = vcmask 523264   ;;  %p257_p1 = scmp.lt.s32.totalorder %s2047_s22, 1  ;;  %p259_p2 = scmp.lt.s32.totalorder %s2043_s21, 1  ;;  %v2062_v0 = vmov 0.0  }
  0x1c   : > { %269 = vst.msk [vmem:[#allocation2] sm:$0xff] %vm268_vm0, %v2062_v0  ;;  %v1789_v1 = vld [vmem:[%s2557_s1 + $0x18] sm:$0xff]  ;;  %v1788_v3 = vld [vmem:[%s2557_s1 + $0x10] sm:$0xff]  ;;  %v1787_v5 = vld [vmem:[%s2557_s1 + $0x8] sm:$0xff]  ;;  %s254_s13 = sand.u32 1, %s2035_s19   ;;  %s1777_s30 = sshll.u32 %s2043_s21, 3 }
  0x1d   : > { %s258_s17 = scalar_select %p257_p1, %s2047_s22, 1  ;;  %270 = vst.msk [vmem:[#allocation2 + $0x8] sm:$0xff] %vm268_vm0, %v2062_v0  ;;  %v1793_v2 = vld [vmem:[%s2557_s1 + $0x38] sm:$0xff]  ;;  %380 = vmatpush.bf16.msra.mxu0 %v1789_v1  ;;  %1834 = vmatpush.bf16.msra.mxu2 %v1789_v1  ;;  %v1792_v4 = vld [vmem:[%s2557_s1 + $0x30] sm:$0xff]  ;;  %v1791_v6 = vld [vmem:[%s2557_s1 + $0x28] sm:$0xff] }
  0x1e   : > { %s260_s26 = scalar_select %p259_p2, %s2043_s21, 1  ;;  %271 = vst.msk [vmem:[#allocation2 + $0x10] sm:$0xff] %vm268_vm0, %v2062_v0  ;;  %1838 = vmatpush.bf16.msra.mxu3 %v1793_v2  ;;  %467 = vmatpush.bf16.msra.mxu1 %v1793_v2  ;;  %v1786_v7 = vld [vmem:[%s2557_s1] sm:$0xff]  ;;  %v1797_v9 = vld [vmem:[%s2557_s1 + $0x58] sm:$0xff]  ;;  %v1796_v14 = vld [vmem:[%s2557_s1 + $0x50] sm:$0xff] }
  0x1f   : > { %272 = vst.msk [vmem:[#allocation2 + $0x18] sm:$0xff] %vm268_vm0, %v2062_v0  ;;  %s1843_s27 = smul.u32 24, %s258_s17  ;;  %v1790_v8 = vld [vmem:[%s2557_s1 + $0x20] sm:$0xff]  ;;  %v1805_v10 = vld [vmem:[%s2557_s1 + $0x78] sm:$0xff]  ;;  %v1804_v15 = vld [vmem:[%s2557_s1 + $0x70] sm:$0xff]  ;;  %s1462_s16 = sshll.u32 %s254_s13, 6 }
  0x20   : > { %273 = vst.msk [vmem:[#allocation2 + $0x20] sm:$0xff] %vm268_vm0, %v2062_v0  ;;  %s1842_s11 = smul.u32 12, %s260_s26  ;;  %v1809_v11 = vld [vmem:[%s2557_s1 + $0x98] sm:$0xff]  ;;  %v1808_v16 = vld [vmem:[%s2557_s1 + $0x90] sm:$0xff]  ;;  %v1795_v18 = vld [vmem:[%s2557_s1 + $0x48] sm:$0xff]  ;;  %s1778_s6 = sshll.u32 %s2047_s22, 4 }
  0x21   : > { %274 = vst.msk [vmem:[#allocation2 + $0x28] sm:$0xff] %vm268_vm0, %v2062_v0  ;;  %381 = vmatpush.bf16.msra.mxu0 %v1788_v3  ;;  %1835 = vmatpush.bf16.msra.mxu2 %v1788_v3  ;;  %v1813_v17 = vld [vmem:[%s2557_s1 + $0xb8] sm:$0xff]  ;;  %v1812_v19 = vld [vmem:[%s2557_s1 + $0xb0] sm:$0xff]  ;;  %v1803_v20 = vld [vmem:[%s2557_s1 + $0x68] sm:$0xff]  ;;  %s1352_s9 = sadd.s32 %s1778_s6, %s1777_s30  ;;  %s1341_s21 = scalar_lea.sflag [#allocation5], %s254_s13 }
  0x22   : > { %275 = vst.msk [vmem:[#allocation2 + $0x30] sm:$0xff] %vm268_vm0, %v2062_v0  ;;  %s263_s17 = sadd.s32 %s1843_s27, %s1842_s11  ;;  %1839 = vmatpush.bf16.msra.mxu3 %v1792_v4  ;;  %468 = vmatpush.bf16.msra.mxu1 %v1792_v4  ;;  %v1807_v21 = vld [vmem:[%s2557_s1 + $0x88] sm:$0xff]  ;;  %v1794_v22 = vld [vmem:[%s2557_s1 + $0x40] sm:$0xff]  ;;  %v1825_v26 = vld [vmem:[%s2557_s1 + $0xf8] sm:$0xff] }
  0x23   : > { %276 = vst.msk [vmem:[#allocation2 + $0x38] sm:$0xff] %vm268_vm0, %v2062_v0  ;;  %s1463_s27 = sshll.u32 %s263_s17, 2  ;;  %v1811_v23 = vld [vmem:[%s2557_s1 + $0xa8] sm:$0xff]  ;;  %v1802_v24 = vld [vmem:[%s2557_s1 + $0x60] sm:$0xff]  ;;  %v1821_v27 = vld [vmem:[%s2557_s1 + $0xd8] sm:$0xff] }
  0x24   : > { %278 = vst.msk [vmem:[#allocation2 + $0x48] sm:$0xff] %vm268_vm0, %v2062_v0  ;;  %s2229_s15 = scalar_lea.vmem %s2556_s0, %s1463_s27  ;;  %v1806_v25 = vld [vmem:[%s2557_s1 + $0x80] sm:$0xff]  ;;  %v1829_v28 = vld [vmem:[%s2557_s1 + $0x118] sm:$0xff]  ;;  %v1824_v32 = vld [vmem:[%s2557_s1 + $0xf0] sm:$0xff]  ;;  %s1779_s27 = sshll.u32 %s1352_s9, 3 }
  0x25   : > { %279 = vst.msk [vmem:[#allocation2 + $0x50] sm:$0xff] %vm268_vm0, %v2062_v0  ;;  %382 = vmatpush.bf16.msra.mxu0 %v1787_v5  ;;  %1836 = vmatpush.bf16.msra.mxu2 %v1787_v5  ;;  %v2250_v12 = vld [vmem:[%s2229_s15] sm:$0xff]  ;;  %v2253_v13 = vld [vmem:[%s2229_s15 + $0x10] sm:$0xff]  ;;  %v1783_v30 = vld [vmem:[%s2229_s15 + $0x8] sm:$0xff]  ;;  %s1354_s12 = scalar_lea.hbm %s2561_s5, %s1779_s27  ;;  %s1981_s9 = scalar_lea.hbm %s2561_s5, 256 }
  0x26   : > { %280 = vst.msk [vmem:[#allocation2 + $0x58] sm:$0xff] %vm268_vm0, %v2062_v0  ;;  %1840 = vmatpush.bf16.msra.mxu3 %v1791_v6  ;;  %469 = vmatpush.bf16.msra.mxu1 %v1791_v6  ;;  %v1810_v29 = vld [vmem:[%s2557_s1 + $0xa0] sm:$0xff]  ;;  %v1785_v31 = vld [vmem:[%s2229_s15 + $0x18] sm:$0xff]  ;;  %v1820_v33 = vld [vmem:[%s2557_s1 + $0xd0] sm:$0xff]  ;;  %s1357_s17 = sshll.u32 %s1354_s12, 4  ;;  %s1358_s17 = int_to_ptr.hbm [resolvable:$true] %s1357_s17 }
  0x27   : > { %281 = vst.msk [vmem:[#allocation2 + $0x60] sm:$0xff] %vm268_vm0, %v2062_v0  ;;  %v1828_v34 = vld [vmem:[%s2557_s1 + $0x110] sm:$0xff]  ;;  %v1798_v35 = vld [vmem:[%s2229_s15 + $0x8] sm:$0xff]  ;;  %v1822_v40 = vld [vmem:[%s2557_s1 + $0xe0] sm:$0xff]  ;;  %s1975_s22 = sshra.s32 %s1358_s17, 4  ;;  %s1976_s22 = int_to_ptr.hbm [resolvable:$true] %s1975_s22 }
  0x28   : > { %282 = vst.msk [vmem:[#allocation2 + $0x68] sm:$0xff] %vm268_vm0, %v2062_v0  ;;  %v1823_v36 = vld [vmem:[%s2557_s1 + $0xe8] sm:$0xff]  ;;  %v1799_v39 = vld [vmem:[%s2229_s15 + $0x10] sm:$0xff]  ;;  %v1818_v41 = vld [vmem:[%s2557_s1 + $0xc0] sm:$0xff]  ;;  %s1977_s26 = scalar_lea.hbm %s1976_s22, 64  ;;  %p1982_p7 = scmp.lt.s32.totalorder %s1976_s22, %s2561_s5 }
  0x29   : > { %283 = vst.msk [vmem:[#allocation2 + $0x70] sm:$0xff] %vm268_vm0, %v2062_v0  ;;  %383 = vmatpush.bf16.msra.mxu0 %v1786_v7  ;;  %1837 = vmatpush.bf16.msra.mxu2 %v1786_v7  ;;  %v1819_v37 = vld [vmem:[%s2557_s1 + $0xc8] sm:$0xff]  ;;  %v1826_v42 = vld [vmem:[%s2557_s1 + $0x100] sm:$0xff]  ;;  %v1800_v43 = vld [vmem:[%s2229_s15 + $0x18] sm:$0xff]  ;;  %p1978_p4 = scmp.ne.s32.totalorder %s1976_s22, %s1977_s26  ;;  %p1983_p9 = scmp.lt.s32.totalorder %s1981_s9, %s1977_s26 }
  0x2a   : > { %284 = vst.msk [vmem:[#allocation2 + $0x78] sm:$0xff] %vm268_vm0, %v2062_v0  ;;  %1841 = vmatpush.bf16.msra.mxu3 %v1790_v8  ;;  %470 = vmatpush.bf16.msra.mxu1 %v1790_v8  ;;  %v1827_v38 = vld [vmem:[%s2557_s1 + $0x108] sm:$0xff]  ;;  %v1801_v44 = vld [vmem:[%s2229_s15 + $0x20] sm:$0xff]  ;;  %v1814_v45 = vld [vmem:[%s2229_s15 + $0x10] sm:$0xff] }
  0x2b   : > { %285 = vst.msk [vmem:[#allocation2 + $0x80] sm:$0xff] %vm268_vm0, %v2062_v0  ;;  %v1815_v46 = vld [vmem:[%s2229_s15 + $0x18] sm:$0xff]  ;;  %v304_v47 = vld [vmem:[#allocation2] sm:$0xff]  ;;  %v422_v51 = vld [vmem:[#allocation2 + $0x48] sm:$0xff]  ;;  %p1979_p5 = pnand %p1978_p4, %p2147_p3  ;;  %p1984_p10 = por %p1983_p9, %p1982_p7 }
  0x2c   : > { %286 = vst.msk [vmem:[#allocation2 + $0x88] sm:$0xff] %vm268_vm0, %v2062_v0  ;;  %1496 = vmatmul.msk.bf16.vlgmr.msra.gmra.mxu0 %vm268_vm0, %v2250_v12  ;;  %1498 = vmatmul.msk.bf16.vlgmr.msra.gmra.mxu2 %vm268_vm0, %v2253_v13  ;;  %v1816_v48 = vld [vmem:[%s2229_s15 + $0x20] sm:$0xff]  ;;  %v305_v57 = vld [vmem:[#allocation2 + $0x8] sm:$0xff]  ;;  %v423_v63 = vld [vmem:[#allocation2 + $0x50] sm:$0xff] }
  0x2d   : > { %287 = vst.msk [vmem:[#allocation2 + $0x90] sm:$0xff] %vm268_vm0, %v2062_v0  ;;  %554 = vmatpush.bf16.msrb.mxu2 %v1797_v9  ;;  %766 = vmatpush.bf16.msrb.mxu0 %v1809_v11  ;;  %v308_v52 = vld [vmem:[#allocation2 + $0x20] sm:$0xff]  ;;  %v306_v5 = vld [vmem:[#allocation2 + $0x10] sm:$0xff]  ;;  %v1817_v8 = vld [vmem:[%s2229_s15 + $0x28] sm:$0xff]  ;;  %s2500_s15 = scalar_lea.vmem [#allocation6], %s1462_s16  ;;  %p1980_p6 = pneg %p1979_p5 }
  0x2e   : > { %288 = vst.msk [vmem:[#allocation2 + $0x98] sm:$0xff] %vm268_vm0, %v2062_v0  ;;  %680 = vmatpush.bf16.msrb.mxu3 %v1805_v10  ;;  %852 = vmatpush.bf16.msrb.mxu1 %v1813_v17  ;;  %s1355_s16 = sshll.u32 %s2500_s15, 4  ;;  %s1356_s16 = int_to_ptr.vmem [resolvable:$true] %s1355_s16 }
  0x2f   : > { %289 = vst.msk [vmem:[#allocation2 + $0xa0] sm:$0xff] %vm268_vm0, %v2062_v0  ;;  %1526 = vmatmul.msk.bf16.vlgmr.msra.gmra.mxu3 %vm268_vm0, %v2253_v13  ;;  %1524 = vmatmul.msk.bf16.vlgmr.msra.gmra.mxu1 %vm268_vm0, %v2250_v12  ;;  %v426_v54 = vld [vmem:[#allocation2 + $0x68] sm:$0xff]  ;;  %p1985_p11 = pnand %p1984_p10, %p1980_p6 }
  0x30   : > { %290 = vst.msk [vmem:[#allocation2 + $0xa8] sm:$0xff] %vm268_vm0, %v2062_v0  ;;  %v427_v2 = vld [vmem:[#allocation2 + $0x70] sm:$0xff] }
  0x31   : > { %291 = vst.msk [vmem:[#allocation2 + $0xb0] sm:$0xff] %vm268_vm0, %v2062_v0  ;;  %555 = vmatpush.bf16.msrb.mxu2 %v1796_v14  ;;  %767 = vmatpush.bf16.msrb.mxu0 %v1808_v16 }
  0x32   : > { %292 = vst.msk [vmem:[#allocation2 + $0xb8] sm:$0xff] %vm268_vm0, %v2062_v0  ;;  %681 = vmatpush.bf16.msrb.mxu3 %v1804_v15  ;;  %853 = vmatpush.bf16.msrb.mxu1 %v1812_v19  ;;  %v428_v15 = vld [vmem:[#allocation2 + $0x78] sm:$0xff] }
  0x33   : > { %293 = vst.msk [vmem:[#allocation2 + $0xc0] sm:$0xff] %vm268_vm0, %v2062_v0 }
  0x34   : > { %294 = vst.msk [vmem:[#allocation2 + $0xc8] sm:$0xff] %vm268_vm0, %v2062_v0 }
  0x35   : > { %295 = vst.msk [vmem:[#allocation2 + $0xd0] sm:$0xff] %vm268_vm0, %v2062_v0  ;;  %556 = vmatpush.bf16.msrb.mxu2 %v1795_v18  ;;  %768 = vmatpush.bf16.msrb.mxu0 %v1807_v21  ;;  %v309_v0 = vld [vmem:[#allocation2 + $0x28] sm:$0xff]  ;;  %v307_v18 = vld [vmem:[#allocation2 + $0x18] sm:$0xff] }
  0x36   : > { %682 = vmatpush.bf16.msrb.mxu3 %v1803_v20  ;;  %854 = vmatpush.bf16.msrb.mxu1 %v1811_v23 }
  0x39   : > { %557 = vmatpush.bf16.msrb.mxu2 %v1794_v22  ;;  %769 = vmatpush.bf16.msrb.mxu0 %v1806_v25  ;;  %v311_v25 = vld [vmem:[#allocation2 + $0x38] sm:$0xff] }
  0x3a   : > { %683 = vmatpush.bf16.msrb.mxu3 %v1802_v24  ;;  %855 = vmatpush.bf16.msrb.mxu1 %v1810_v29  ;;  %v425_v24 = vld [vmem:[#allocation2 + $0x60] sm:$0xff] }
  0x3c   : > { %1497 = vmatmul.msk.bf16.gmra.mxu0 %vm268_vm0, %v1783_v30  ;;  %1499 = vmatmul.msk.bf16.gmra.mxu2 %vm268_vm0, %v1785_v31 }
  0x3d   : > { %978 = vmatpush.bf16.msra.mxu2 %v1821_v27  ;;  %1150 = vmatpush.bf16.msra.mxu0 %v1829_v28  ;;  %v429_v27 = vld [vmem:[#allocation2 + $0x80] sm:$0xff] }
  0x3e   : > { %1064 = vmatpush.bf16.msra.mxu3 %v1825_v26 }
  0x3f   : > { %1527 = vmatmul.msk.bf16.gmra.mxu3 %vm268_vm0, %v1785_v31  ;;  %1525 = vmatmul.msk.bf16.gmra.mxu1 %vm268_vm0, %v1783_v30 }
  0x41   : > { %979 = vmatpush.bf16.msra.mxu2 %v1820_v33  ;;  %1151 = vmatpush.bf16.msra.mxu0 %v1828_v34 }
  0x42   : > { %1065 = vmatpush.bf16.msra.mxu3 %v1824_v32 }
  0x45   : > { %980 = vmatpush.bf16.msra.mxu2 %v1819_v37  ;;  %1152 = vmatpush.bf16.msra.mxu0 %v1827_v38 }
  0x46   : > { %1066 = vmatpush.bf16.msra.mxu3 %v1823_v36  ;;  %v509_v36 = vld [vmem:[#allocation2 + $0x90] sm:$0xff] }
  0x49   : > { %981 = vmatpush.bf16.msra.mxu2 %v1818_v41  ;;  %1153 = vmatpush.bf16.msra.mxu0 %v1826_v42 }
  0x4a   : > { %1067 = vmatpush.bf16.msra.mxu3 %v1822_v40 }
  0x4c   : > { %1552 = vmatmul.msk.bf16.vlgmr.msrb.gmra.mxu2 %vm268_vm0, %v2250_v12  ;;  %1624 = vmatmul.msk.bf16.vlgmr.msrb.gmra.mxu0 %vm268_vm0, %v1798_v35  ;;  %v424_v12 = vld [vmem:[#allocation2 + $0x58] sm:$0xff] }
  0x4f   : > { %1596 = vmatmul.msk.bf16.vlgmr.msrb.gmra.mxu3 %vm268_vm0, %v1798_v35  ;;  %1652 = vmatmul.msk.bf16.vlgmr.msrb.gmra.mxu1 %vm268_vm0, %v1798_v35 }
  0x5c   : > { %1553 = vmatmul.msk.bf16.gmra.mxu2 %vm268_vm0, %v1783_v30  ;;  %1625 = vmatmul.msk.bf16.gmra.mxu0 %vm268_vm0, %v1799_v39 }
  0x5f   : > { %1597 = vmatmul.msk.bf16.gmra.mxu3 %vm268_vm0, %v1799_v39  ;;  %1653 = vmatmul.msk.bf16.gmra.mxu1 %vm268_vm0, %v1799_v39 }
  0x6c   : > { %1554 = vmatmul.msk.bf16.gmra.mxu2 %vm268_vm0, %v2253_v13  ;;  %1626 = vmatmul.msk.bf16.gmra.mxu0 %vm268_vm0, %v1800_v43  ;;  %v310_v13 = vld [vmem:[#allocation2 + $0x30] sm:$0xff] }
  0x6f   : > { %1598 = vmatmul.msk.bf16.gmra.mxu3 %vm268_vm0, %v1800_v43  ;;  %1654 = vmatmul.msk.bf16.gmra.mxu1 %vm268_vm0, %v1800_v43 }
  0x7c   : > { %1555 = vmatmul.msk.bf16.gmra.mxu2 %vm268_vm0, %v1785_v31  ;;  %1627 = vmatmul.msk.bf16.gmra.mxu0 %vm268_vm0, %v1801_v44 }
  0x7f   : > { %1599 = vmatmul.msk.bf16.gmra.mxu3 %vm268_vm0, %v1801_v44  ;;  %1655 = vmatmul.msk.bf16.gmra.mxu1 %vm268_vm0, %v1801_v44 }
  0x8c   : > { %1696 = vmatmul.msk.bf16.vlgmr.msra.gmra.mxu2 %vm268_vm0, %v1814_v45  ;;  %1752 = vmatmul.msk.bf16.vlgmr.msra.gmra.mxu0 %vm268_vm0, %v1814_v45 }
  0x8f   : > { %1724 = vmatmul.msk.bf16.vlgmr.msra.gmra.mxu3 %vm268_vm0, %v1814_v45 }
  0x9c   : > { %1697 = vmatmul.msk.bf16.gmra.mxu2 %vm268_vm0, %v1815_v46  ;;  %1753 = vmatmul.msk.bf16.gmra.mxu0 %vm268_vm0, %v1815_v46 }
  0x9f   : > { %1725 = vmatmul.msk.bf16.gmra.mxu3 %vm268_vm0, %v1815_v46  ;;  %v510_v46 = vld [vmem:[#allocation2 + $0x98] sm:$0xff] }
  0xa9   : > { %v385_v49 = vpop.f32.mrf.mxu0 }
  0xaa   : > { %v405_v50 = vadd.f32 %v385_v49, %v304_v47 }
  0xac   : > { %413 = vst.msk [vmem:[#allocation2] sm:$0xff] %vm268_vm0, %v405_v50  ;;  %1698 = vmatmul.msk.bf16.gmra.mxu2 %vm268_vm0, %v1816_v48  ;;  %1754 = vmatmul.msk.bf16.gmra.mxu0 %vm268_vm0, %v1816_v48  ;;  %v472_v53 = vpop.f32.mrf.mxu1 }
  0xad   : > { %v492_v55 = vadd.f32 %v472_v53, %v422_v51 }
  0xaf   : > { %1726 = vmatmul.msk.bf16.gmra.mxu3 %vm268_vm0, %v1816_v48  ;;  %v395_v56 = vpop.f32.mrf.mxu2  ;;  %500 = vst.msk [vmem:[#allocation2 + $0x48] sm:$0xff] %vm268_vm0, %v492_v55  ;;  %v1833_v48 = vld [vmem:[%s2559_s3 + $0x18] sm:$0xff] }
  0xb0   : > { %v409_v58 = vadd.f32 %v395_v56, %v308_v52  ;;  %1307 = vmatpush.bf16.msra.mxu1 %v1833_v48 }
  0xb1   : > { %v387_v61 = vpop.f32.mrf.mxu0 }
  0xb2   : > { %v482_v59 = vpop.f32.mrf.mxu3  ;;  %417 = vst.msk [vmem:[#allocation2 + $0x20] sm:$0xff] %vm268_vm0, %v409_v58  ;;  %v406_v62 = vadd.f32 %v387_v61, %v305_v57 }
  0xb3   : > { %v496_v60 = vadd.f32 %v482_v59, %v426_v54  ;;  %v603_v41 = vld [vmem:[#allocation2] sm:$0xff] }
  0xb4   : > { %414 = vst.msk [vmem:[#allocation2 + $0x8] sm:$0xff] %vm268_vm0, %v406_v62  ;;  %v474_v1 = vpop.f32.mrf.mxu1  ;;  %v511_v59 = vld [vmem:[#allocation2 + $0xa0] sm:$0xff] }
  0xb5   : > { %504 = vst.msk [vmem:[#allocation2 + $0x68] sm:$0xff] %vm268_vm0, %v496_v60  ;;  %v493_v3 = vadd.f32 %v474_v1, %v423_v63 }
  0xb6   : > { %v721_v30 = vld [vmem:[#allocation2 + $0x48] sm:$0xff] }
  0xb7   : > { %v397_v4 = vpop.f32.mrf.mxu2  ;;  %501 = vst.msk [vmem:[#allocation2 + $0x50] sm:$0xff] %vm268_vm0, %v493_v3 }
  0xb8   : > { %v410_v6 = vadd.f32 %v397_v4, %v309_v0 }
  0xb9   : > { %v390_v10 = vpop.f32.mrf.mxu0 }
  0xba   : > { %v484_v7 = vpop.f32.mrf.mxu3  ;;  %418 = vst.msk [vmem:[#allocation2 + $0x28] sm:$0xff] %vm268_vm0, %v410_v6  ;;  %v407_v11 = vadd.f32 %v390_v10, %v306_v5 }
  0xbb   : > { %v497_v9 = vadd.f32 %v484_v7, %v427_v2  ;;  %v604_v52 = vld [vmem:[#allocation2 + $0x8] sm:$0xff] }
  0xbc   : > { %415 = vst.msk [vmem:[#allocation2 + $0x10] sm:$0xff] %vm268_vm0, %v407_v11  ;;  %1699 = vmatmul.msk.bf16.gmra.mxu2 %vm268_vm0, %v1817_v8  ;;  %1755 = vmatmul.msk.bf16.gmra.mxu0 %vm268_vm0, %v1817_v8  ;;  %v477_v14 = vpop.f32.mrf.mxu1  ;;  %v512_v7 = vld [vmem:[#allocation2 + $0xa8] sm:$0xff] }
  0xbd   : > { %505 = vst.msk [vmem:[#allocation2 + $0x70] sm:$0xff] %vm268_vm0, %v497_v9  ;;  %v494_v16 = vadd.f32 %v477_v14, %v424_v12 }
  0xbe   : > { %v722_v39 = vld [vmem:[#allocation2 + $0x50] sm:$0xff] }
  0xbf   : > { %1727 = vmatmul.msk.bf16.gmra.mxu3 %vm268_vm0, %v1817_v8  ;;  %v400_v17 = vpop.f32.mrf.mxu2  ;;  %502 = vst.msk [vmem:[#allocation2 + $0x58] sm:$0xff] %vm268_vm0, %v494_v16  ;;  %v1832_v8 = vld [vmem:[%s2559_s3 + $0x10] sm:$0xff] }
  0xc0   : > { %v411_v19 = vadd.f32 %v400_v17, %v310_v13  ;;  %1308 = vmatpush.bf16.msra.mxu1 %v1832_v8 }
  0xc1   : > { %v392_v22 = vpop.f32.mrf.mxu0 }
  0xc2   : > { %v487_v20 = vpop.f32.mrf.mxu3  ;;  %419 = vst.msk [vmem:[#allocation2 + $0x30] sm:$0xff] %vm268_vm0, %v411_v19  ;;  %v408_v23 = vadd.f32 %v392_v22, %v307_v18 }
  0xc3   : > { %v498_v21 = vadd.f32 %v487_v20, %v428_v15  ;;  %v605_v0 = vld [vmem:[#allocation2 + $0x10] sm:$0xff]  ;;  %v725_v15 = vld [vmem:[#allocation2 + $0x68] sm:$0xff] }
  0xc4   : > { %416 = vst.msk [vmem:[#allocation2 + $0x18] sm:$0xff] %vm268_vm0, %v408_v23  ;;  %v479_v26 = vpop.f32.mrf.mxu1  ;;  %v513_v20 = vld [vmem:[#allocation2 + $0xb0] sm:$0xff]  ;;  %v607_v23 = vld [vmem:[#allocation2 + $0x20] sm:$0xff] }
  0xc5   : > { %506 = vst.msk [vmem:[#allocation2 + $0x78] sm:$0xff] %vm268_vm0, %v498_v21  ;;  %v495_v28 = vadd.f32 %v479_v26, %v425_v24  ;;  %v726_v26 = vld [vmem:[#allocation2 + $0x70] sm:$0xff] }
  0xc6   : > { %v723_v50 = vld [vmem:[#allocation2 + $0x58] sm:$0xff] }
  0xc7   : > { %v402_v29 = vpop.f32.mrf.mxu2  ;;  %503 = vst.msk [vmem:[#allocation2 + $0x60] sm:$0xff] %vm268_vm0, %v495_v28 }
  0xc8   : > { %v412_v31 = vadd.f32 %v402_v29, %v311_v25 }
  0xc9   : > { %v771_v34 = vpop.f32.mrf.mxu0  ;;  %v609_v48 = vld [vmem:[#allocation2 + $0x30] sm:$0xff] }
  0xca   : > { %v489_v32 = vpop.f32.mrf.mxu3  ;;  %420 = vst.msk [vmem:[#allocation2 + $0x38] sm:$0xff] %vm268_vm0, %v412_v31  ;;  %v791_v35 = vadd.f32 %v771_v34, %v721_v30 }
  0xcb   : > { %v499_v33 = vadd.f32 %v489_v32, %v429_v27  ;;  %v606_v12 = vld [vmem:[#allocation2 + $0x18] sm:$0xff] }
  0xcc   : > { %799 = vst.msk [vmem:[#allocation2 + $0x48] sm:$0xff] %vm268_vm0, %v791_v35  ;;  %v857_v37 = vpop.f32.mrf.mxu1  ;;  %v514_v32 = vld [vmem:[#allocation2 + $0xb8] sm:$0xff] }
  0xcd   : > { %507 = vst.msk [vmem:[#allocation2 + $0x80] sm:$0xff] %vm268_vm0, %v499_v33  ;;  %v1831_v33 = vld [vmem:[%s2559_s3 + $0x8] sm:$0xff] }
  0xce   : > { %v724_v62 = vld [vmem:[#allocation2 + $0x60] sm:$0xff]  ;;  %1309 = vmatpush.bf16.msra.mxu1 %v1831_v33 }
  0xcf   : > { %v559_v38 = vpop.f32.mrf.mxu2 }
  0xd0   : > { %v579_v40 = vadd.f32 %v559_v38, %v509_v36  ;;  %v608_v36 = vld [vmem:[#allocation2 + $0x28] sm:$0xff] }
  0xd1   : > { %v773_v44 = vpop.f32.mrf.mxu0 }
  0xd2   : > { %v685_v42 = vpop.f32.mrf.mxu3  ;;  %587 = vst.msk [vmem:[#allocation2 + $0x90] sm:$0xff] %vm268_vm0, %v579_v40  ;;  %v792_v45 = vadd.f32 %v773_v44, %v722_v39  ;;  %v727_v39 = vld [vmem:[#allocation2 + $0x78] sm:$0xff] }
  0xd3   : > { %v705_v43 = vadd.f32 %v685_v42, %v603_v41 }
  0xd4   : > { %800 = vst.msk [vmem:[#allocation2 + $0x50] sm:$0xff] %vm268_vm0, %v792_v45  ;;  %v859_v47 = vpop.f32.mrf.mxu1  ;;  %v515_v45 = vld [vmem:[#allocation2 + $0xc0] sm:$0xff] }
  0xd5   : > { %713 = vst.msk [vmem:[#allocation2] sm:$0xff] %vm268_vm0, %v705_v43 }
  0xd7   : > { %v561_v49 = vpop.f32.mrf.mxu2 }
  0xd8   : > { %v580_v51 = vadd.f32 %v561_v49, %v510_v46 }
  0xd9   : > { %v776_v55 = vpop.f32.mrf.mxu0  ;;  %v807_v56 = vld [vmem:[#allocation2 + $0x90] sm:$0xff] }
  0xda   : > { %v687_v53 = vpop.f32.mrf.mxu3  ;;  %588 = vst.msk [vmem:[#allocation2 + $0x98] sm:$0xff] %vm268_vm0, %v580_v51  ;;  %v793_v57 = vadd.f32 %v776_v55, %v723_v50  ;;  %v877_v58 = vadd.f32 %v857_v37, %v807_v56  ;;  %v728_v51 = vld [vmem:[#allocation2 + $0x80] sm:$0xff] }
  0xdb   : > { %v706_v54 = vadd.f32 %v687_v53, %v604_v52  ;;  %v1830_v56 = vld [vmem:[%s2559_s3] sm:$0xff] }
  0xdc   : > { %801 = vst.msk [vmem:[#allocation2 + $0x58] sm:$0xff] %vm268_vm0, %v793_v57  ;;  %v862_v60 = vpop.f32.mrf.mxu1  ;;  %v516_v57 = vld [vmem:[#allocation2 + $0xc8] sm:$0xff]  ;;  %1310 = vmatpush.bf16.msra.mxu1 %v1830_v56 }
  0xdd   : > { %714 = vst.msk [vmem:[#allocation2 + $0x8] sm:$0xff] %vm268_vm0, %v706_v54 }
  0xde   : > { %885 = vst.msk [vmem:[#allocation2 + $0x90] sm:$0xff] %vm268_vm0, %v877_v58 }
  0xdf   : > { %v564_v61 = vpop.f32.mrf.mxu2 }
  0xe0   : > { %v581_v63 = vadd.f32 %v564_v61, %v511_v59  ;;  %v610_v61 = vld [vmem:[#allocation2 + $0x38] sm:$0xff] }
  0xe1   : > { %v778_v3 = vpop.f32.mrf.mxu0  ;;  %v808_v4 = vld [vmem:[#allocation2 + $0x98] sm:$0xff] }
  0xe2   : > { %v690_v1 = vpop.f32.mrf.mxu3  ;;  %589 = vst.msk [vmem:[#allocation2 + $0xa0] sm:$0xff] %vm268_vm0, %v581_v63  ;;  %v794_v5 = vadd.f32 %v778_v3, %v724_v62  ;;  %v878_v6 = vadd.f32 %v859_v47, %v808_v4 }
  0xe3   : > { %v707_v2 = vadd.f32 %v690_v1, %v605_v0 }
  0xe4   : > { %802 = vst.msk [vmem:[#allocation2 + $0x60] sm:$0xff] %vm268_vm0, %v794_v5  ;;  %v864_v10 = vpop.f32.mrf.mxu1  ;;  %v901_v5 = vld [vmem:[#allocation2] sm:$0xff] }
  0xe5   : > { %715 = vst.msk [vmem:[#allocation2 + $0x10] sm:$0xff] %vm268_vm0, %v707_v2  ;;  %v1105_v1 = vld [vmem:[#allocation2 + $0x90] sm:$0xff] }
  0xe6   : > { %886 = vst.msk [vmem:[#allocation2 + $0x98] sm:$0xff] %vm268_vm0, %v878_v6 }
  0xe7   : > { %v566_v9 = vpop.f32.mrf.mxu2 }
  0xe8   : > { %v582_v11 = vadd.f32 %v566_v9, %v512_v7  ;;  %v1019_v9 = vld [vmem:[#allocation2 + $0x48] sm:$0xff] }
  0xe9   : > { %v781_v16 = vpop.f32.mrf.mxu0  ;;  %v809_v17 = vld [vmem:[#allocation2 + $0xa0] sm:$0xff] }
  0xea   : > { %v692_v13 = vpop.f32.mrf.mxu3  ;;  %590 = vst.msk [vmem:[#allocation2 + $0xa8] sm:$0xff] %vm268_vm0, %v582_v11  ;;  %v795_v18 = vadd.f32 %v781_v16, %v725_v15  ;;  %v879_v19 = vadd.f32 %v862_v60, %v809_v17  ;;  %v902_v17 = vld [vmem:[#allocation2 + $0x8] sm:$0xff] }
  0xeb   : > { %v708_v14 = vadd.f32 %v692_v13, %v606_v12 }
  0xec   : > { %803 = vst.msk [vmem:[#allocation2 + $0x68] sm:$0xff] %vm268_vm0, %v795_v18  ;;  %v867_v29 = vpop.f32.mrf.mxu1 }
  0xed   : > { %716 = vst.msk [vmem:[#allocation2 + $0x18] sm:$0xff] %vm268_vm0, %v708_v14  ;;  %v1106_v13 = vld [vmem:[#allocation2 + $0x98] sm:$0xff] }
  0xee   : > { %887 = vst.msk [vmem:[#allocation2 + $0xa0] sm:$0xff] %vm268_vm0, %v879_v19 }
  0xef   : > { %v569_v21 = vpop.f32.mrf.mxu2 }
  0xf0   : > { %v583_v22 = vadd.f32 %v569_v21, %v513_v20  ;;  %v1020_v20 = vld [vmem:[#allocation2 + $0x50] sm:$0xff] }
  0xf1   : > { %v783_v27 = vpop.f32.mrf.mxu0  ;;  %v810_v28 = vld [vmem:[#allocation2 + $0xa8] sm:$0xff] }
  0xf2   : > { %v695_v24 = vpop.f32.mrf.mxu3  ;;  %591 = vst.msk [vmem:[#allocation2 + $0xb0] sm:$0xff] %vm268_vm0, %v583_v22  ;;  %v796_v30 = vadd.f32 %v783_v27, %v726_v26  ;;  %v880_v31 = vadd.f32 %v864_v10, %v810_v28  ;;  %v903_v26 = vld [vmem:[#allocation2 + $0x10] sm:$0xff] }
  0xf3   : > { %v709_v25 = vadd.f32 %v695_v24, %v607_v23 }
  0xf4   : > { %804 = vst.msk [vmem:[#allocation2 + $0x70] sm:$0xff] %vm268_vm0, %v796_v30  ;;  %v869_v44 = vpop.f32.mrf.mxu1 }
  0xf5   : > { %717 = vst.msk [vmem:[#allocation2 + $0x20] sm:$0xff] %vm268_vm0, %v709_v25  ;;  %v1107_v23 = vld [vmem:[#allocation2 + $0xa0] sm:$0xff] }
  0xf6   : > { %888 = vst.msk [vmem:[#allocation2 + $0xa8] sm:$0xff] %vm268_vm0, %v880_v31 }
  0xf7   : > { %v571_v34 = vpop.f32.mrf.mxu2 }
  0xf8   : > { %v584_v35 = vadd.f32 %v571_v34, %v514_v32 }
  0xf9   : > { %v786_v40 = vpop.f32.mrf.mxu0  ;;  %v811_v41 = vld [vmem:[#allocation2 + $0xb0] sm:$0xff] }
  0xfa   : > { %v697_v37 = vpop.f32.mrf.mxu3  ;;  %592 = vst.msk [vmem:[#allocation2 + $0xb8] sm:$0xff] %vm268_vm0, %v584_v35  ;;  %v797_v42 = vadd.f32 %v786_v40, %v727_v39  ;;  %v881_v43 = vadd.f32 %v867_v29, %v811_v41  ;;  %v1021_v29 = vld [vmem:[#allocation2 + $0x58] sm:$0xff]  ;;  %v1022_v41 = vld [vmem:[#allocation2 + $0x60] sm:$0xff] }
  0xfb   : > { %v710_v38 = vadd.f32 %v697_v37, %v608_v36 }
  0xfc   : > { %805 = vst.msk [vmem:[#allocation2 + $0x78] sm:$0xff] %vm268_vm0, %v797_v42  ;;  %v872_v58 = vpop.f32.mrf.mxu1  ;;  %v905_v56 = vld [vmem:[#allocation2 + $0x20] sm:$0xff] }
  0xfd   : > { %718 = vst.msk [vmem:[#allocation2 + $0x28] sm:$0xff] %vm268_vm0, %v710_v38  ;;  %v1108_v32 = vld [vmem:[#allocation2 + $0xa8] sm:$0xff]  ;;  %v904_v38 = vld [vmem:[#allocation2 + $0x18] sm:$0xff] }
  0xfe   : > { %889 = vst.msk [vmem:[#allocation2 + $0xb0] sm:$0xff] %vm268_vm0, %v881_v43 }
  0xff   : > { %v574_v46 = vpop.f32.mrf.mxu2 }
 0x100   : > { %v585_v47 = vadd.f32 %v574_v46, %v515_v45 }
 0x101   : > { %v788_v52 = vpop.f32.mrf.mxu0  ;;  %v812_v53 = vld [vmem:[#allocation2 + $0xb8] sm:$0xff] }
 0x102   : > { %v700_v49 = vpop.f32.mrf.mxu3  ;;  %593 = vst.msk [vmem:[#allocation2 + $0xc0] sm:$0xff] %vm268_vm0, %v585_v47  ;;  %v798_v54 = vadd.f32 %v788_v52, %v728_v51  ;;  %v882_v55 = vadd.f32 %v869_v44, %v812_v53 }
 0x103   : > { %v711_v50 = vadd.f32 %v700_v49, %v609_v48  ;;  %v2466_v48 = vld [vmem:[#allocation3] ss:$0 sm:$0xff] }
 0x104   : > { %806 = vst.msk [vmem:[#allocation2 + $0x80] sm:$0xff] %vm268_vm0, %v798_v54  ;;  %v874_v7 = vpop.f32.mrf.mxu1 }
 0x105   : > { %719 = vst.msk [vmem:[#allocation2 + $0x30] sm:$0xff] %vm268_vm0, %v711_v50  ;;  %v1109_v45 = vld [vmem:[#allocation2 + $0xb0] sm:$0xff] }
 0x106   : > { %890 = vst.msk [vmem:[#allocation2 + $0xb8] sm:$0xff] %vm268_vm0, %v882_v55 }
 0x107   : > { %v576_v59 = vpop.f32.mrf.mxu2 }
 0x108   : > { %v586_v60 = vadd.f32 %v576_v59, %v516_v57 }
 0x109   : > { %v813_v0 = vld [vmem:[#allocation2 + $0xc0] sm:$0xff]  ;;  %v1155_v2 = vpop.f32.mrf.mxu0 }
 0x10a   : > { %v702_v62 = vpop.f32.mrf.mxu3  ;;  %594 = vst.msk [vmem:[#allocation2 + $0xc8] sm:$0xff] %vm268_vm0, %v586_v60  ;;  %v883_v3 = vadd.f32 %v872_v58, %v813_v0  ;;  %v1175_v4 = vadd.f32 %v1155_v2, %v1105_v1  ;;  %v1023_v60 = vld [vmem:[#allocation2 + $0x68] sm:$0xff] }
 0x10b   : > { %v712_v63 = vadd.f32 %v702_v62, %v610_v61 }
 0x10c   : > { %891 = vst.msk [vmem:[#allocation2 + $0xc0] sm:$0xff] %vm268_vm0, %v883_v3 }
 0x10d   : > { %720 = vst.msk [vmem:[#allocation2 + $0x38] sm:$0xff] %vm268_vm0, %v712_v63  ;;  %v1110_v63 = vld [vmem:[#allocation2 + $0xb8] sm:$0xff] }
 0x10e   : > { %1183 = vst.msk [vmem:[#allocation2 + $0x90] sm:$0xff] %vm268_vm0, %v1175_v4 }
 0x10f   : > { %v983_v6 = vpop.f32.mrf.mxu2 }
 0x110   : > { %v1003_v8 = vadd.f32 %v983_v6, %v901_v5 }
 0x111   : > { %v814_v12 = vld [vmem:[#allocation2 + $0xc8] sm:$0xff]  ;;  %v1157_v14 = vpop.f32.mrf.mxu0 }
 0x112   : > { %v1069_v10 = vpop.f32.mrf.mxu3  ;;  %1011 = vst.msk [vmem:[#allocation2] sm:$0xff] %vm268_vm0, %v1003_v8  ;;  %v884_v15 = vadd.f32 %v874_v7, %v814_v12  ;;  %v1176_v16 = vadd.f32 %v1157_v14, %v1106_v13  ;;  %v906_v8 = vld [vmem:[#allocation2 + $0x28] sm:$0xff] }
 0x113   : > { %v1089_v11 = vadd.f32 %v1069_v10, %v1019_v9 }
 0x114   : > { %892 = vst.msk [vmem:[#allocation2 + $0xc8] sm:$0xff] %vm268_vm0, %v884_v15  ;;  %v1111_v15 = vld [vmem:[#allocation2 + $0xc0] sm:$0xff] }
 0x115   : > { %1097 = vst.msk [vmem:[#allocation2 + $0x48] sm:$0xff] %vm268_vm0, %v1089_v11  ;;  %v1024_v11 = vld [vmem:[#allocation2 + $0x70] sm:$0xff] }
 0x116   : > { %1184 = vst.msk [vmem:[#allocation2 + $0x98] sm:$0xff] %vm268_vm0, %v1176_v16 }
 0x117   : > { %v985_v18 = vpop.f32.mrf.mxu2 }
 0x118   : > { %v1004_v19 = vadd.f32 %v985_v18, %v902_v17 }
 0x119   : > { %v1160_v24 = vpop.f32.mrf.mxu0  ;;  %v1191_v36 = vld [vmem:[#allocation2] sm:$0xff] }
 0x11a   : > { %v1071_v21 = vpop.f32.mrf.mxu3  ;;  %1012 = vst.msk [vmem:[#allocation2 + $0x8] sm:$0xff] %vm268_vm0, %v1004_v19  ;;  %v1177_v25 = vadd.f32 %v1160_v24, %v1107_v23 }
 0x11b   : > { %v1090_v22 = vadd.f32 %v1071_v21, %v1020_v20 }
 0x11c   : > { %1185 = vst.msk [vmem:[#allocation2 + $0xa0] sm:$0xff] %vm268_vm0, %v1177_v25  ;;  %v907_v25 = vld [vmem:[#allocation2 + $0x30] sm:$0xff] }
 0x11d   : > { %1098 = vst.msk [vmem:[#allocation2 + $0x50] sm:$0xff] %vm268_vm0, %v1090_v22  ;;  %v1215_v43 = vld [vmem:[#allocation2 + $0x92] sm:$0xff] }
 0x11f   : > { %v988_v27 = vpop.f32.mrf.mxu2 }
 0x120   : > { %v1005_v28 = vadd.f32 %v988_v27, %v903_v26 }
 0x121   : > { %v1162_v33 = vpop.f32.mrf.mxu0  ;;  %v1192_v50 = vld [vmem:[#allocation2 + $0x8] sm:$0xff] }
 0x122   : > { %v1074_v30 = vpop.f32.mrf.mxu3  ;;  %1013 = vst.msk [vmem:[#allocation2 + $0x10] sm:$0xff] %vm268_vm0, %v1005_v28  ;;  %v1178_v34 = vadd.f32 %v1162_v33, %v1108_v32  ;;  %v1112_v32 = vld [vmem:[#allocation2 + $0xc8] sm:$0xff] }
 0x123   : > { %v1091_v31 = vadd.f32 %v1074_v30, %v1021_v29  ;;  %v1216_v53 = vld [vmem:[#allocation2 + $0x9a] sm:$0xff] }
 0x124   : > { %v1199_v35 = vld [vmem:[#allocation2 + $0x49] sm:$0xff]  ;;  %1186 = vst.msk [vmem:[#allocation2 + $0xa8] sm:$0xff] %vm268_vm0, %v1178_v34  ;;  %v1025_v29 = vld [vmem:[#allocation2 + $0x78] sm:$0xff] }
 0x125   : > { %1099 = vst.msk [vmem:[#allocation2 + $0x58] sm:$0xff] %vm268_vm0, %v1091_v31  ;;  %v1207_v37 = vadd.f32 %v1199_v35, %v1191_v36 }
 0x127   : > { %v990_v39 = vpop.f32.mrf.mxu2  ;;  %v1223_v47 = vadd.f32 %v1215_v43, %v1207_v37 }
 0x128   : > { %v1006_v40 = vadd.f32 %v990_v39, %v904_v38 }
 0x129   : > { %v1165_v46 = vpop.f32.mrf.mxu0  ;;  %v1235_v55 = vadd.f32 %v2466_v48, %v1223_v47  ;;  %v1193_v6 = vld [vmem:[#allocation2 + $0x10] sm:$0xff] }
 0x12a   : > { %v1076_v42 = vpop.f32.mrf.mxu3  ;;  %1014 = vst.msk [vmem:[#allocation2 + $0x18] sm:$0xff] %vm268_vm0, %v1006_v40  ;;  %v1179_v49 = vadd.f32 %v1165_v46, %v1109_v45 }
 0x12b   : > { %v1092_v44 = vadd.f32 %v1076_v42, %v1022_v41  ;;  %v1243_v1 = vmax.f32 %v1235_v55, 0.0  ;;  %v1217_v13 = vld [vmem:[#allocation2 + $0xa2] sm:$0xff]  ;;  %v908_v41 = vld [vmem:[#allocation2 + $0x38] sm:$0xff] }
 0x12c   : > { %v1200_v51 = vld [vmem:[#allocation2 + $0x51] sm:$0xff]  ;;  %1187 = vst.msk [vmem:[#allocation2 + $0xb0] sm:$0xff] %vm268_vm0, %v1179_v49 }
 0x12d   : > { %1100 = vst.msk [vmem:[#allocation2 + $0x60] sm:$0xff] %vm268_vm0, %v1092_v44  ;;  %v1208_v52 = vadd.f32 %v1200_v51, %v1192_v50  ;;  %v1026_v44 = vld [vmem:[#allocation2 + $0x80] sm:$0xff] }
 0x12f   : > { %v1224_v54 = vadd.f32 %v1216_v53, %v1208_v52  ;;  %v993_v57 = vpop.f32.mrf.mxu2 }
 0x130   : > { %v1007_v59 = vadd.f32 %v993_v57, %v905_v56 }
 0x131   : > { %v1236_v58 = vadd.f32 %v2466_v48, %v1224_v54  ;;  %v1167_v0 = vpop.f32.mrf.mxu0  ;;  %v1194_v19 = vld [vmem:[#allocation2 + $0x18] sm:$0xff] }
 0x132   : > { %v1079_v61 = vpop.f32.mrf.mxu3  ;;  %1015 = vst.msk [vmem:[#allocation2 + $0x20] sm:$0xff] %vm268_vm0, %v1007_v59  ;;  %v1180_v3 = vadd.f32 %v1167_v0, %v1110_v63 }
 0x133   : > { %v1093_v62 = vadd.f32 %v1079_v61, %v1023_v60  ;;  %v1244_v2 = vmax.f32 %v1236_v58, 0.0  ;;  %v1218_v22 = vld [vmem:[#allocation2 + $0xaa] sm:$0xff] }
 0x134   : > { %v1201_v4 = vld [vmem:[#allocation2 + $0x59] sm:$0xff]  ;;  %1188 = vst.msk [vmem:[#allocation2 + $0xb8] sm:$0xff] %vm268_vm0, %v1180_v3 }
 0x135   : > { %1101 = vst.msk [vmem:[#allocation2 + $0x68] sm:$0xff] %vm268_vm0, %v1093_v62  ;;  %v1251_v5 = vpack.c.bf16 %v1244_v2, %v1243_v1  ;;  %v1209_v7 = vadd.f32 %v1201_v4, %v1193_v6 }
 0x137   : > { %1772 = vmatmul.msk.bf16.vlgmr.msra.gmra.mxu1 %vm268_vm0, %v1251_v5  ;;  %v995_v9 = vpop.f32.mrf.mxu2  ;;  %v1225_v17 = vadd.f32 %v1217_v13, %v1209_v7 }
 0x138   : > { %v1008_v10 = vadd.f32 %v995_v9, %v906_v8 }
 0x139   : > { %v1170_v16 = vpop.f32.mrf.mxu0  ;;  %v1237_v24 = vadd.f32 %v2466_v48, %v1225_v17  ;;  %v1195_v39 = vld [vmem:[#allocation2 + $0x20] sm:$0xff] }
 0x13a   : > { %v1081_v12 = vpop.f32.mrf.mxu3  ;;  %1016 = vst.msk [vmem:[#allocation2 + $0x28] sm:$0xff] %vm268_vm0, %v1008_v10  ;;  %v1181_v18 = vadd.f32 %v1170_v16, %v1111_v15 }
 0x13b   : > { %v1094_v14 = vadd.f32 %v1081_v12, %v1024_v11  ;;  %v1245_v34 = vmax.f32 %v1237_v24, 0.0  ;;  %v1219_v46 = vld [vmem:[#allocation2 + $0xb2] sm:$0xff]  ;;  %v1930_v11 = vld [vmem:[%s2560_s4] ss:$0 sm:$0xff] }
 0x13c   : > { %v1202_v20 = vld [vmem:[#allocation2 + $0x61] sm:$0xff]  ;;  %1189 = vst.msk [vmem:[#allocation2 + $0xc0] sm:$0xff] %vm268_vm0, %v1181_v18 }
 0x13d   : > { %1102 = vst.msk [vmem:[#allocation2 + $0x70] sm:$0xff] %vm268_vm0, %v1094_v14  ;;  %v1210_v21 = vadd.f32 %v1202_v20, %v1194_v19 }
 0x13f   : > { %v1226_v23 = vadd.f32 %v1218_v22, %v1210_v21  ;;  %v998_v26 = vpop.f32.mrf.mxu2 }
 0x140   : > { %v1009_v28 = vadd.f32 %v998_v26, %v907_v25 }
 0x141   : > { %v1238_v27 = vadd.f32 %v2466_v48, %v1226_v23  ;;  %v1172_v33 = vpop.f32.mrf.mxu0  ;;  %v1196_v50 = vld [vmem:[#allocation2 + $0x28] sm:$0xff] }
 0x142   : > { %v1084_v30 = vpop.f32.mrf.mxu3  ;;  %1017 = vst.msk [vmem:[#allocation2 + $0x30] sm:$0xff] %vm268_vm0, %v1009_v28  ;;  %v1182_v36 = vadd.f32 %v1172_v33, %v1112_v32 }
 0x143   : > { %v1095_v31 = vadd.f32 %v1084_v30, %v1025_v29  ;;  %v1246_v35 = vmax.f32 %v1238_v27, 0.0  ;;  %v1220_v53 = vld [vmem:[#allocation2 + $0xba] sm:$0xff] }
 0x144   : > { %v1203_v37 = vld [vmem:[#allocation2 + $0x69] sm:$0xff]  ;;  %1190 = vst.msk [vmem:[#allocation2 + $0xc8] sm:$0xff] %vm268_vm0, %v1182_v36 }
 0x145   : > { %1103 = vst.msk [vmem:[#allocation2 + $0x78] sm:$0xff] %vm268_vm0, %v1095_v31  ;;  %v1252_v38 = vpack.c.bf16 %v1246_v35, %v1245_v34  ;;  %v1211_v40 = vadd.f32 %v1203_v37, %v1195_v39 }
 0x147   : > { %1773 = vmatmul.msk.bf16.gmra.mxu1 %vm268_vm0, %v1252_v38  ;;  %v1000_v42 = vpop.f32.mrf.mxu2  ;;  %v1227_v49 = vadd.f32 %v1219_v46, %v1211_v40 }
 0x148   : > { %v1010_v43 = vadd.f32 %v1000_v42, %v908_v41 }
 0x149   : > { %v1239_v55 = vadd.f32 %v2466_v48, %v1227_v49  ;;  %v1197_v60 = vld [vmem:[#allocation2 + $0x30] sm:$0xff] }
 0x14a   : > { %v1086_v45 = vpop.f32.mrf.mxu3  ;;  %1018 = vst.msk [vmem:[#allocation2 + $0x38] sm:$0xff] %vm268_vm0, %v1010_v43 }
 0x14b   : > { %v1096_v47 = vadd.f32 %v1086_v45, %v1026_v44  ;;  %v1247_v57 = vmax.f32 %v1239_v55, 0.0  ;;  %v1221_v2 = vld [vmem:[#allocation2 + $0xc2] sm:$0xff]  ;;  %v1222_v3 = vld [vmem:[#allocation2 + $0xca] sm:$0xff] }
 0x14c   : > { %v1204_v51 = vld [vmem:[#allocation2 + $0x71] sm:$0xff] }
 0x14d   : > { %1104 = vst.msk [vmem:[#allocation2 + $0x80] sm:$0xff] %vm268_vm0, %v1096_v47  ;;  %v1212_v52 = vadd.f32 %v1204_v51, %v1196_v50 }
 0x14f   : > { %v1228_v54 = vadd.f32 %v1220_v53, %v1212_v52 }
 0x151   : > { %v1240_v56 = vadd.f32 %v2466_v48, %v1228_v54  ;;  %v1198_v59 = vld [vmem:[#allocation2 + $0x38] sm:$0xff] }
 0x153   : > { %v1248_v58 = vmax.f32 %v1240_v56, 0.0 }
 0x154   : > { %v1205_v61 = vld [vmem:[#allocation2 + $0x79] sm:$0xff]  ;;  %v1206_v62 = vld [vmem:[#allocation2 + $0x81] sm:$0xff] }
 0x155   : > { %v1253_v63 = vpack.c.bf16 %v1248_v58, %v1247_v57  ;;  %v1213_v0 = vadd.f32 %v1205_v61, %v1197_v60  ;;  %v1214_v1 = vadd.f32 %v1206_v62, %v1198_v59 }
 0x157   : > { %1774 = vmatmul.msk.bf16.gmra.mxu1 %vm268_vm0, %v1253_v63  ;;  %v1229_v4 = vadd.f32 %v1221_v2, %v1213_v0  ;;  %v1230_v5 = vadd.f32 %v1222_v3, %v1214_v1 }
 0x159   : > { %v1241_v6 = vadd.f32 %v2466_v48, %v1229_v4  ;;  %v1242_v7 = vadd.f32 %v2466_v48, %v1230_v5 }
 0x15b   : > { %v1249_v8 = vmax.f32 %v1241_v6, 0.0  ;;  %v1250_v9 = vmax.f32 %v1242_v7, 0.0 }
 0x15d   : > { %v1254_v10 = vpack.c.bf16 %v1250_v9, %v1249_v8 }
 0x167   : > { %1775 = vmatmul.msk.bf16.gmra.mxu1 %vm268_vm0, %v1254_v10 }
 0x1b4   : > { %v1312_v12 = vpop.f32.mrf.mxu1 }
 0x1b5   : > { %v1313_v13 = vadd.f32 %v1930_v11, %v1312_v12 }
 0x1b7   : > { %1332 = vst [vmem:[%s2500_s15] sm:$0xff] %v1313_v13 }
 0x1bc   : > { %v1314_v48 = vpop.f32.mrf.mxu1 }
 0x1bd   : > { %v1315_v14 = vadd.f32 %v1930_v11, %v1314_v48 }
 0x1bf   : > { %1333 = vst [vmem:[%s2500_s15 + $0x8] sm:$0xff] %v1315_v14 }
 0x1c4   : > { %v1317_v15 = vpop.f32.mrf.mxu1 }
 0x1c5   : > { %v1318_v16 = vadd.f32 %v1930_v11, %v1317_v15 }
 0x1c7   : > { %1334 = vst [vmem:[%s2500_s15 + $0x10] sm:$0xff] %v1318_v16 }
 0x1cc   : > { %v1319_v17 = vpop.f32.mrf.mxu1 }
 0x1cd   : > { %v1320_v18 = vadd.f32 %v1930_v11, %v1319_v17 }
 0x1cf   : > { %1335 = vst [vmem:[%s2500_s15 + $0x18] sm:$0xff] %v1320_v18 }
 0x1d4   : > { %v1322_v19 = vpop.f32.mrf.mxu1 }
 0x1d5   : > { %v1323_v20 = vadd.f32 %v1930_v11, %v1322_v19 }
 0x1d7   : > { %1336 = vst [vmem:[%s2500_s15 + $0x20] sm:$0xff] %v1323_v20 }
 0x1dc   : > { %v1324_v21 = vpop.f32.mrf.mxu1 }
 0x1dd   : > { %v1325_v22 = vadd.f32 %v1930_v11, %v1324_v21 }
 0x1df   : > { %1337 = vst [vmem:[%s2500_s15 + $0x28] sm:$0xff] %v1325_v22 }
 0x1e4   : > { %v1327_v23 = vpop.f32.mrf.mxu1 }
 0x1e5   : > { %v1328_v24 = vadd.f32 %v1930_v11, %v1327_v23 }
 0x1e7   : > { %1338 = vst [vmem:[%s2500_s15 + $0x30] sm:$0xff] %v1328_v24 }
 0x1ec   : > { %v1329_v25 = vpop.f32.mrf.mxu1 }
 0x1ed   : > { %v1330_v26 = vadd.f32 %v1930_v11, %v1329_v25 }
 0x1ef   : > { %1339 = vst [vmem:[%s2500_s15 + $0x38] sm:$0xff] %v1330_v26 }
 0x1f0   : > { %1988 = shalt.err (!%p1985_p11)
}
 0x1f1   : > { %s2063_s13 = smov 128   ;;  %s2064_s15 = smov 8  }
 0x1f2   : > { %1848 = dma.vmem_to_hbm [thread:$0]  (%p2147_p3), %s1356_s16, 1024, %s1358_s17, %s1341_s21, %s2063_s13, %s2063_s13, %s2064_s15  }
 0x1f3 PF: > { %p1860_p12 = scmp.ge.s32.totalorder %s2059_s25, 2  ;;  %s1372_s11 = sand.u32 1, %s2031_s18  }
 0x1f4   : > { %s1373_s12 = scalar_lea.sflag [#allocation5], %s1372_s11 }
 0x1f5   : > { %p1855_p13 = pnand %p1860_p12, %p2156_p8 }
 0x1f7   : > { %p1856_p0 = pneg %p1855_p13 }
 0x1f9   : > { %2026 = dma.done.wait (%p1856_p0), %s1373_s12, 1024  }
 0x1fa   : > { %2028 = vsyncadd (%p1856_p0), %s1373_s12, 4294966272  ;;  %s19_s25 = sadd.s32 1, %s2059_s25   ;;  %s2564_s18 = smov %s2035_s19 }
 0x1fb   : > { %p16_p1 = scmp.ge.s32.totalorder %s19_s25, 6   ;;  %s2565_s19 = smov %s2039_s20 }
 0x1fc   : > { %s2566_s20 = smov %s2167_s14  ;;  %s2567_s21 = smov %s2051_s23 }
 0x1fd   : > { %s2568_s22 = smov %s2055_s24  ;;  %s2569_s23 = smov %s2572_s28 }
 0x1fe   : > { %s2570_s24 = smov %s2576_s29  ;;  %18 = sbr.rel (!%p16_p1) target bundleno = 6 (0x6), region = 90 }
 0x203   :  { %1379 = vsyncpa [#allocation4], 1 }
 0x204   :  { %1381 = vsyncpa [#allocation4 + $0x1], 1 }
 0x205   :  { %1382 = vsyncpa [#allocation5], 1 }
 0x206   :  { %1384 = vsyncpa [#allocation5 + $0x1], 1 }

</bundles_post_ra>
